<compile_context>
chip_gen: v7x
topology: tpu7x:2x2x1
jax: 0.10.0
libtpu: 0.0.40
codegen_flags: <defaults>
</compile_context>

<pallas_src>
import functools

import jax
import jax.numpy as jnp
from jax import lax
from jax.experimental import pallas as pl
from jax.experimental.pallas import tpu as pltpu


# Set to jnp.bfloat16 on v6e/v7x for MXU-native matmuls (keep f32 accumulation
# via preferred_element_type and f32 elementwise/gate math).
MATMUL_DTYPE = jnp.float32

_VMEM = functools.partial(pl.BlockSpec, memory_space=pltpu.MemorySpace.VMEM)


def _round_up(x, m):
    return ((x + m - 1) // m) * m


# ----------------------------------------------------------------------------
# Char-CNN: single fused conv matmul + per-position maxima + relu + fused
# highway layer(s) + projection.  Token rows are time-major: row = t*Bp + b.
# ----------------------------------------------------------------------------
def _fuse_conv_weights(conv_ws, C, E):
    """Build a zero-padded weight [C*E, sum_f(l_out_f*num_f)] so the whole
    char conv (all filters, all output positions) is one matmul.
    Returns (fused_weight, meta) with meta = [(num, l_out, col_base), ...]."""
    cols, meta, base = [], [], 0
    for cw in conv_ws:                       # cw: [width, E, num]
        width, _, num = cw.shape
        l_out = C - width + 1
        for t in range(l_out):
            blk = jnp.zeros((C, E, num), cw.dtype).at[t:t + width].set(cw)
            cols.append(blk.reshape(C * E, num))
        meta.append((num, l_out, base))
        base += l_out * num
    return jnp.concatenate(cols, axis=-1), meta
    # NOTE: for production filter sizes, per-filter im2col avoids the
    # zero-padding FLOP waste; at these shapes one fused matmul wins.


def char_cnn_pallas(x_flat, conv_w_fused, conv_meta, conv_bs,
                    hw_w, hw_b, proj_w, proj_b):
    # x_flat: [N, C*E]   conv_w_fused: [C*E, total_cols]
    N = x_flat.shape[0]
    Fdim, P = proj_w.shape
    n_conv = len(conv_bs)

    def kernel(x_ref, cwf_ref, *rest):
        cb_refs = rest[:n_conv]
        hw_w_ref, hw_b_ref, pw_ref, pb_ref, out_ref = rest[n_conv:]

        x = x_ref[...].astype(MATMUL_DTYPE)
        # one MXU op for every filter / every conv output position
        z = jnp.dot(x, cwf_ref[...].astype(MATMUL_DTYPE),
                    preferred_element_type=jnp.float32)      # [N, total_cols]

        convs = []
        for ci, (num, l_out, base) in enumerate(conv_meta):
            best = z[:, base:base + num]
            for t in range(1, l_out):                        # cheap VPU maxima
                best = jnp.maximum(best, z[:, base + t * num:base + (t + 1) * num])
            convs.append(jnp.maximum(best + cb_refs[ci][...], 0.0))
        token = jnp.concatenate(convs, axis=-1)              # [N, F]

        n_hw = hw_w_ref.shape[0]
        for l in range(n_hw):
            # fused [F, 2F] highway matmul (nonlinear | gate)
            hwz = jnp.dot(token.astype(MATMUL_DTYPE),
                          hw_w_ref[l].astype(MATMUL_DTYPE),
                          preferred_element_type=jnp.float32) + hw_b_ref[l]
            nonlin = jnp.maximum(hwz[:, :Fdim], 0.0)
            gate = jax.nn.sigmoid(hwz[:, Fdim:])
            token = gate * token + (1.0 - gate) * nonlin     # matches the spec module

        out_ref[...] = (jnp.dot(token.astype(MATMUL_DTYPE),
                                pw_ref[...].astype(MATMUL_DTYPE),
                                preferred_element_type=jnp.float32)
                        + pb_ref[...])

    n_in = 2 + n_conv + 4
    return pl.pallas_call(
        kernel,
        out_shape=jax.ShapeDtypeStruct((N, P), jnp.float32),
        in_specs=[_VMEM()] * n_in,
        out_specs=_VMEM(),
    )(x_flat, conv_w_fused, *conv_bs, hw_w, hw_b, proj_w, proj_b)


# ----------------------------------------------------------------------------
# Fused bidirectional LSTM stack.  grid=(2,) over direction (parallel -> uses
# both TCs on v7x); all layers chained inside the kernel, VMEM resident.
# Gate order i, f, g, o (PyTorch), weights pre-fused to [P, 4P].
# ----------------------------------------------------------------------------
def bilstm_stack_pallas(x2, w_ih, w_hh, bias, S, Bp, P):
    # x2: [2, S*Bp, P]   w_ih/w_hh: [2, L, P, 4P]   bias: [2, L, 1, 4P]
    L = w_ih.shape[1]
    G = 4 * P
    R = S * Bp

    def kernel(x_ref, wih_ref, whh_ref, b_ref, o_ref,
               cur_scr, xproj_scr, h_scr, c_scr):
        cur_scr[...] = x_ref[...]
        for l in range(L):                                   # small static loop
            # input projection hoisted out of the recurrence: one big matmul,
            # bias added once per layer (not per timestep).
            xproj_scr[...] = (
                jnp.dot(cur_scr[...].astype(MATMUL_DTYPE),
                        wih_ref[l].astype(MATMUL_DTYPE),
                        preferred_element_type=jnp.float32) + b_ref[l])
            whh_l = whh_ref[l].astype(MATMUL_DTYPE)          # hoisted weight load
            h_scr[...] = jnp.zeros_like(h_scr)
            c_scr[...] = jnp.zeros_like(c_scr)

            def step(t, carry, whh_l=whh_l):
                row = pl.multiple_of(t * Bp, Bp)             # sublane-aligned block
                gates = xproj_scr[pl.ds(row, Bp), :] + jnp.dot(
                    h_scr[...].astype(MATMUL_DTYPE), whh_l,
                    preferred_element_type=jnp.float32)      # [Bp, 4P], one dot
                i_g = jax.nn.sigmoid(gates[:, 0 * P:1 * P])
                f_g = jax.nn.sigmoid(gates[:, 1 * P:2 * P])
                g_g = jnp.tanh(gates[:, 2 * P:3 * P])
                o_g = jax.nn.sigmoid(gates[:, 3 * P:4 * P])
                c_new = f_g * c_scr[...] + i_g * g_g
                h_new = o_g * jnp.tanh(c_new)
                c_scr[...] = c_new
                h_scr[...] = h_new
                o_ref[pl.ds(row, Bp), :] = h_new
                return carry

            lax.fori_loop(0, S, step, 0, unroll=True)        # give LLO full visibility

            if l != 0:                                       # residual (layer_id != 0)
                o_ref[...] = o_ref[...] + cur_scr[...]
            if l != L - 1:
                cur_scr[...] = o_ref[...]

    return pl.pallas_call(
        kernel,
        out_shape=jax.ShapeDtypeStruct((2, R, P), jnp.float32),
        grid=(2,),
        in_specs=[
            pl.BlockSpec((None, R, P), lambda d: (d, 0, 0)),
            pl.BlockSpec((None, L, P, G), lambda d: (d, 0, 0, 0)),
            pl.BlockSpec((None, L, P, G), lambda d: (d, 0, 0, 0)),
            pl.BlockSpec((None, L, 1, G), lambda d: (d, 0, 0, 0)),
        ],
        out_specs=pl.BlockSpec((None, R, P), lambda d: (d, 0, 0)),
        scratch_shapes=[
            pltpu.VMEM((R, P), jnp.float32),    # current layer input
            pltpu.VMEM((R, G), jnp.float32),    # precomputed x @ W_ih + b
            pltpu.VMEM((Bp, P), jnp.float32),   # h
            pltpu.VMEM((Bp, P), jnp.float32),   # c
        ],
        compiler_params=pltpu.CompilerParams(
            dimension_semantics=("parallel",)),
    )(x2, w_ih, w_hh, bias)


# ----------------------------------------------------------------------------
# Classifier + summed cross-entropy (both directions concatenated into one
# [R, P] row batch), tiled over rows, scalar accumulator in the output block.
# Matches nn.CrossEntropyLoss(reduction='sum', ignore_index=-1) / batch_size.
# ----------------------------------------------------------------------------
def loss_pallas(feat, cls_w, cls_b, lab, batch_size):
    R, Pf = feat.shape
    V = cls_w.shape[1]
    inv_b = 1.0 / float(batch_size)

    row_tile = 512 if R >= 512 else _round_up(R, 8)
    R_pad = _round_up(R, row_tile)
    if R_pad != R:                                           # padded rows -> label -1
        feat = jnp.pad(feat, ((0, R_pad - R), (0, 0)))
        lab = jnp.pad(lab, ((0, R_pad - R), (0, 0)), constant_values=-1)

    def kernel(f_ref, w_ref, b_ref, l_ref, out_ref):
        @pl.when(pl.program_id(0) == 0)
        def _():
            out_ref[...] = jnp.zeros_like(out_ref)

        logits = jnp.dot(f_ref[...].astype(MATMUL_DTYPE),
                         w_ref[...].astype(MATMUL_DTYPE),
                         preferred_element_type=jnp.float32) + b_ref[...]
        m = jnp.max(logits, axis=-1, keepdims=True)
        z = logits - m
        lse = jnp.log(jnp.sum(jnp.exp(z), axis=-1, keepdims=True))
        logp = z - lse                                       # [rows, V]
        lab_v = l_ref[...]                                   # [rows, 1]
        # TODO(synk): for production vocab sizes, tile over V with an online
        # logsumexp and a scalar-prefetched label gather instead of iota one-hot.
        iota = lax.broadcasted_iota(jnp.int32, logp.shape, 1)
        tgt = jnp.sum(jnp.where(iota == lab_v, logp, 0.0), axis=-1, keepdims=True)
        masked = jnp.where(lab_v != -1, tgt, 0.0)
        out_ref[...] += -jnp.sum(masked, axis=0, keepdims=True) * inv_b

    return pl.pallas_call(
        kernel,
        out_shape=jax.ShapeDtypeStruct((1, 1), jnp.float32),
        grid=(R_pad // row_tile,),
        in_specs=[
            pl.BlockSpec((row_tile, Pf), lambda i: (i, 0)),
            pl.BlockSpec((Pf, V), lambda i: (0, 0)),
            pl.BlockSpec((1, V), lambda i: (0, 0)),
            pl.BlockSpec((row_tile, 1), lambda i: (i, 0)),
        ],
        out_specs=pl.BlockSpec((1, 1), lambda i: (0, 0)),
        compiler_params=pltpu.CompilerParams(
            dimension_semantics=("arbitrary",)),
    )(feat, cls_w, cls_b, lab)


# ----------------------------------------------------------------------------
# Full ELMoLM forward (glue in plain JAX, hot paths in Pallas kernels).
# ----------------------------------------------------------------------------
def elmo_lm_forward(params, x_chars, labels, cfg):
    B, S, C = x_chars.shape
    E = cfg["char_embed_dim"]
    P = cfg["projection_dim"]

    # pad batch to a sublane multiple; padded rows carry label -1 (ignored).
    Bp = _round_up(max(B, 8), 8)
    xc = jnp.pad(x_chars, ((0, Bp - B), (0, 0), (0, 0)))
    lab = jnp.pad(labels, ((0, Bp - B), (0, 0)), constant_values=-1).astype(jnp.int32)

    # --- char CNN on time-major token rows (row = t*Bp + b) -----------------
    xc_tm = jnp.transpose(xc, (1, 0, 2))                     # [S, Bp, C]
    # char embedding lookup (gather) stays in plain JAX glue
    emb = params["char_emb"][xc_tm]                          # [S, Bp, C, E]
    x_flat = emb.reshape(S * Bp, C * E).astype(jnp.float32)

    conv_w_fused, conv_meta = _fuse_conv_weights(params["conv_w"], C, E)
    tok = char_cnn_pallas(x_flat, conv_w_fused, conv_meta, params["conv_b"],
                          params["hw_w"], params["hw_b"],
                          params["proj_w"], params["proj_b"])  # [S*Bp, P]

    # --- fused bidirectional LSTM stack (no feature transposes needed) ------
    tok3 = tok.reshape(S, Bp, P)
    x2 = jnp.stack([tok, jnp.flip(tok3, axis=0).reshape(S * Bp, P)], axis=0)
    out2 = bilstm_stack_pallas(x2, params["lstm_wih"], params["lstm_whh"],
                               params["lstm_b"], S, Bp, P)     # [2, S*Bp, P]

    # --- classifier + summed CE, both directions in one row batch -----------
    feat = out2.reshape(2 * S * Bp, P)
    lab_f = jnp.transpose(lab, (1, 0)).reshape(S * Bp, 1)
    lab_b = jnp.transpose(jnp.flip(lab, axis=1), (1, 0)).reshape(S * Bp, 1)
    lab2 = jnp.concatenate([lab_f, lab_b], axis=0)            # [2*S*Bp, 1]

    loss = loss_pallas(feat, params["cls_w"], params["cls_b"], lab2, B)
    return loss[0, 0]


# ----------------------------------------------------------------------------
# Pure-JAX reference (unpadded, batch-first) for the correctness check.
# ----------------------------------------------------------------------------
def ref_forward(params, x_chars, labels, cfg):
    B, S, C = x_chars.shape
    E = cfg["char_embed_dim"]
    P = cfg["projection_dim"]
    N = B * S

    x = params["char_emb"][x_chars].reshape(N, C, E)
    convs = []
    for cw, cb in zip(params["conv_w"], params["conv_b"]):
        width = cw.shape[0]
        l_out = C - width + 1
        outs = []
        for t in range(l_out):
            acc = cb
            for w in range(width):
                acc = acc + x[:, t + w, :] @ cw[w]
            outs.append(acc)
        convs.append(jnp.maximum(jnp.max(jnp.stack(outs, 0), 0), 0.0))
    token = jnp.concatenate(convs, axis=-1)
    F = token.shape[-1]
    for l in range(cfg["n_highway"]):
        hw = token @ params["hw_w"][l] + params["hw_b"][l]
        nonlin = jnp.maximum(hw[:, :F], 0.0)
        gate = jax.nn.sigmoid(hw[:, F:])
        token = gate * token + (1.0 - gate) * nonlin
    tok = (token @ params["proj_w"] + params["proj_b"]).reshape(B, S, P)

    def lstm_ref(xseq, w_ih, w_hh, bias):
        Bm, Sm, Pm = xseq.shape

        def step(carry, x_t):
            h, c = carry
            g = x_t @ w_ih + h @ w_hh + bias
            i_g = jax.nn.sigmoid(g[:, :Pm])
            f_g = jax.nn.sigmoid(g[:, Pm:2 * Pm])
            g_g = jnp.tanh(g[:, 2 * Pm:3 * Pm])
            o_g = jax.nn.sigmoid(g[:, 3 * Pm:])
            c = f_g * c + i_g * g_g
            h = o_g * jnp.tanh(c)
            return (h, c), h

        x_tm = jnp.transpose(xseq, (1, 0, 2))
        (_, _), hs = lax.scan(step, (jnp.zeros((Bm, Pm)), jnp.zeros((Bm, Pm))), x_tm)
        return jnp.transpose(hs, (1, 0, 2))

    fwd, bwd = tok, jnp.flip(tok, axis=1)
    for l in range(cfg["n_layers"]):
        f_out = lstm_ref(fwd, params["lstm_wih"][0, l], params["lstm_whh"][0, l],
                         params["lstm_b"][0, l])
        b_out = lstm_ref(bwd, params["lstm_wih"][1, l], params["lstm_whh"][1, l],
                         params["lstm_b"][1, l])
        if l != 0:
            f_out = f_out + fwd
            b_out = b_out + bwd
        fwd, bwd = f_out, b_out

    def ce(logits, lab):
        logp = jax.nn.log_softmax(logits, axis=-1)
        onehot = jax.nn.one_hot(jnp.where(lab < 0, 0, lab), logits.shape[-1])
        tgt = jnp.sum(onehot * logp, axis=-1)
        valid = (lab != -1).astype(jnp.float32)
        return -jnp.sum(tgt * valid)

    f_logits = fwd.reshape(N, P) @ params["cls_w"] + params["cls_b"]
    b_logits = bwd.reshape(N, P) @ params["cls_w"] + params["cls_b"]
    return (ce(f_logits, labels.reshape(-1))
            + ce(b_logits, jnp.flip(labels, axis=1).reshape(-1))) / B


# ----------------------------------------------------------------------------
if __name__ == "__main__":
    cfg = dict(
        char_embed_num=32,
        char_embed_dim=8,
        char_cnn_filters=[(1, 8), (2, 8), (3, 16)],
        n_filters=32,
        n_highway=1,
        projection_dim=16,
        n_layers=2,
        vocab_size=32,
    )
    B, S, C = 2, 8, 8
    E, F, P, V = (cfg["char_embed_dim"], cfg["n_filters"],
                  cfg["projection_dim"], cfg["vocab_size"])
    L = cfg["n_layers"]

    key = jax.random.PRNGKey(0)
    key_iter = iter(jax.random.split(key, 64))

    def nrm(shape, scale=0.1):
        return (scale * jax.random.normal(next(key_iter), shape)).astype(jnp.float32)

    params = {
        "char_emb": nrm((cfg["char_embed_num"], E), 1.0),
        "conv_w": [nrm((w, E, n)) for (w, n) in cfg["char_cnn_filters"]],
        "conv_b": [nrm((1, n)) for (_, n) in cfg["char_cnn_filters"]],
        "hw_w": nrm((cfg["n_highway"], F, 2 * F)),     # [.., :F] nonlin | [.., F:] gate
        "hw_b": nrm((cfg["n_highway"], 1, 2 * F)),
        "proj_w": nrm((F, P)),
        "proj_b": nrm((1, P)),
        "lstm_wih": nrm((2, L, P, 4 * P)),             # fused gates i|f|g|o
        "lstm_whh": nrm((2, L, P, 4 * P)),
        "lstm_b": nrm((2, L, 1, 4 * P)),
        "cls_w": nrm((P, V)),
        "cls_b": nrm((1, V)),
    }

    x_chars = jax.random.randint(next(key_iter), (B, S, C), 0, cfg["char_embed_num"])
    labels = jax.random.randint(next(key_iter), (B, S), 0, V)
    labels = labels.at[0, 0].set(-1)   # exercise ignore_index=-1

    loss = jax.block_until_ready(elmo_lm_forward(params, x_chars, labels, cfg))
    ref = jax.block_until_ready(ref_forward(params, x_chars, labels, cfg))

    assert jnp.isfinite(loss), loss
    assert jnp.allclose(loss, ref, rtol=5e-4, atol=5e-4), (float(loss), float(ref))

    print("KERNEL_OK")
</pallas_src>

<mosaic_0001>
module attributes {stable_mosaic.version = 11 : i64} {
  func.func @kernel(%arg0: memref<64x64xf32, #tpu.memory_space<vmem>>, %arg1: memref<64x216xf32, #tpu.memory_space<vmem>>, %arg2: memref<1x8xf32, #tpu.memory_space<vmem>>, %arg3: memref<1x8xf32, #tpu.memory_space<vmem>>, %arg4: memref<1x16xf32, #tpu.memory_space<vmem>>, %arg5: memref<1x32x64xf32, #tpu.memory_space<vmem>>, %arg6: memref<1x1x64xf32, #tpu.memory_space<vmem>>, %arg7: memref<32x16xf32, #tpu.memory_space<vmem>>, %arg8: memref<1x16xf32, #tpu.memory_space<vmem>>, %arg9: memref<64x16xf32, #tpu.memory_space<vmem>>) attributes {dimension_semantics = [], scalar_prefetch = 0 : i64, scratch_operands = 0 : i64, tpu.core_type = #tpu.core_type<tc>} {
    %c0 = arith.constant 0 : index
    %c0_0 = arith.constant 0 : index
    %0 = vector.load %arg0[%c0, %c0_0] : memref<64x64xf32, #tpu.memory_space<vmem>>, vector<64x64xf32>
    %c0_1 = arith.constant 0 : index
    %c0_2 = arith.constant 0 : index
    %1 = vector.load %arg1[%c0_1, %c0_2] : memref<64x216xf32, #tpu.memory_space<vmem>>, vector<64x216xf32>
    %cst = arith.constant dense<0.000000e+00> : vector<64x216xf32>
    %2 = tpu.matmul %0, %1, %cst {dimension_numbers = #tpu.dot_dimension_numbers<[1], [0], [0], [1], [0, 0, 1, 1], [], []>} : vector<64x64xf32>, vector<64x216xf32>, vector<64x216xf32> -> vector<64x216xf32>
    %3 = vector.extract_strided_slice %2 {offsets = [0, 0], sizes = [64, 8], strides = [1, 1]} : vector<64x216xf32> to vector<64x8xf32>
    %4 = vector.extract_strided_slice %2 {offsets = [0, 8], sizes = [64, 8], strides = [1, 1]} : vector<64x216xf32> to vector<64x8xf32>
    %5 = arith.maximumf %3, %4 : vector<64x8xf32>
    %6 = vector.extract_strided_slice %2 {offsets = [0, 16], sizes = [64, 8], strides = [1, 1]} : vector<64x216xf32> to vector<64x8xf32>
    %7 = arith.maximumf %5, %6 : vector<64x8xf32>
    %8 = vector.extract_strided_slice %2 {offsets = [0, 24], sizes = [64, 8], strides = [1, 1]} : vector<64x216xf32> to vector<64x8xf32>
    %9 = arith.maximumf %7, %8 : vector<64x8xf32>
    %10 = vector.extract_strided_slice %2 {offsets = [0, 32], sizes = [64, 8], strides = [1, 1]} : vector<64x216xf32> to vector<64x8xf32>
    %11 = arith.maximumf %9, %10 : vector<64x8xf32>
    %12 = vector.extract_strided_slice %2 {offsets = [0, 40], sizes = [64, 8], strides = [1, 1]} : vector<64x216xf32> to vector<64x8xf32>
    %13 = arith.maximumf %11, %12 : vector<64x8xf32>
    %14 = vector.extract_strided_slice %2 {offsets = [0, 48], sizes = [64, 8], strides = [1, 1]} : vector<64x216xf32> to vector<64x8xf32>
    %15 = arith.maximumf %13, %14 : vector<64x8xf32>
    %16 = vector.extract_strided_slice %2 {offsets = [0, 56], sizes = [64, 8], strides = [1, 1]} : vector<64x216xf32> to vector<64x8xf32>
    %17 = arith.maximumf %15, %16 : vector<64x8xf32>
    %c0_3 = arith.constant 0 : index
    %c0_4 = arith.constant 0 : index
    %18 = vector.load %arg2[%c0_3, %c0_4] : memref<1x8xf32, #tpu.memory_space<vmem>>, vector<1x8xf32>
    %19 = vector.broadcast %18 : vector<1x8xf32> to vector<64x8xf32>
    %20 = arith.addf %17, %19 : vector<64x8xf32>
    %cst_5 = arith.constant 0.000000e+00 : f32
    %21 = vector.broadcast %cst_5 : f32 to vector<64x8xf32>
    %22 = arith.maximumf %20, %21 : vector<64x8xf32>
    %23 = vector.extract_strided_slice %2 {offsets = [0, 64], sizes = [64, 8], strides = [1, 1]} : vector<64x216xf32> to vector<64x8xf32>
    %24 = vector.extract_strided_slice %2 {offsets = [0, 72], sizes = [64, 8], strides = [1, 1]} : vector<64x216xf32> to vector<64x8xf32>
    %25 = arith.maximumf %23, %24 : vector<64x8xf32>
    %26 = vector.extract_strided_slice %2 {offsets = [0, 80], sizes = [64, 8], strides = [1, 1]} : vector<64x216xf32> to vector<64x8xf32>
    %27 = arith.maximumf %25, %26 : vector<64x8xf32>
    %28 = vector.extract_strided_slice %2 {offsets = [0, 88], sizes = [64, 8], strides = [1, 1]} : vector<64x216xf32> to vector<64x8xf32>
    %29 = arith.maximumf %27, %28 : vector<64x8xf32>
    %30 = vector.extract_strided_slice %2 {offsets = [0, 96], sizes = [64, 8], strides = [1, 1]} : vector<64x216xf32> to vector<64x8xf32>
    %31 = arith.maximumf %29, %30 : vector<64x8xf32>
    %32 = vector.extract_strided_slice %2 {offsets = [0, 104], sizes = [64, 8], strides = [1, 1]} : vector<64x216xf32> to vector<64x8xf32>
    %33 = arith.maximumf %31, %32 : vector<64x8xf32>
    %34 = vector.extract_strided_slice %2 {offsets = [0, 112], sizes = [64, 8], strides = [1, 1]} : vector<64x216xf32> to vector<64x8xf32>
    %35 = arith.maximumf %33, %34 : vector<64x8xf32>
    %c0_6 = arith.constant 0 : index
    %c0_7 = arith.constant 0 : index
    %36 = vector.load %arg3[%c0_6, %c0_7] : memref<1x8xf32, #tpu.memory_space<vmem>>, vector<1x8xf32>
    %37 = vector.broadcast %36 : vector<1x8xf32> to vector<64x8xf32>
    %38 = arith.addf %35, %37 : vector<64x8xf32>
    %cst_8 = arith.constant 0.000000e+00 : f32
    %39 = vector.broadcast %cst_8 : f32 to vector<64x8xf32>
    %40 = arith.maximumf %38, %39 : vector<64x8xf32>
    %41 = vector.extract_strided_slice %2 {offsets = [0, 120], sizes = [64, 16], strides = [1, 1]} : vector<64x216xf32> to vector<64x16xf32>
    %42 = vector.extract_strided_slice %2 {offsets = [0, 136], sizes = [64, 16], strides = [1, 1]} : vector<64x216xf32> to vector<64x16xf32>
    %43 = arith.maximumf %41, %42 : vector<64x16xf32>
    %44 = vector.extract_strided_slice %2 {offsets = [0, 152], sizes = [64, 16], strides = [1, 1]} : vector<64x216xf32> to vector<64x16xf32>
    %45 = arith.maximumf %43, %44 : vector<64x16xf32>
    %46 = vector.extract_strided_slice %2 {offsets = [0, 168], sizes = [64, 16], strides = [1, 1]} : vector<64x216xf32> to vector<64x16xf32>
    %47 = arith.maximumf %45, %46 : vector<64x16xf32>
    %48 = vector.extract_strided_slice %2 {offsets = [0, 184], sizes = [64, 16], strides = [1, 1]} : vector<64x216xf32> to vector<64x16xf32>
    %49 = arith.maximumf %47, %48 : vector<64x16xf32>
    %50 = vector.extract_strided_slice %2 {offsets = [0, 200], sizes = [64, 16], strides = [1, 1]} : vector<64x216xf32> to vector<64x16xf32>
    %51 = arith.maximumf %49, %50 : vector<64x16xf32>
    %c0_9 = arith.constant 0 : index
    %c0_10 = arith.constant 0 : index
    %52 = vector.load %arg4[%c0_9, %c0_10] : memref<1x16xf32, #tpu.memory_space<vmem>>, vector<1x16xf32>
    %53 = vector.broadcast %52 : vector<1x16xf32> to vector<64x16xf32>
    %54 = arith.addf %51, %53 : vector<64x16xf32>
    %cst_11 = arith.constant 0.000000e+00 : f32
    %55 = vector.broadcast %cst_11 : f32 to vector<64x16xf32>
    %56 = arith.maximumf %54, %55 : vector<64x16xf32>
    %57 = tpu.concatenate %22, %40, %56 in 1 : vector<64x8xf32>, vector<64x8xf32>, vector<64x16xf32> -> vector<64x32xf32>
    %c0_12 = arith.constant 0 : index
    %c0_13 = arith.constant 0 : index
    %c0_14 = arith.constant 0 : index
    %58 = vector.load %arg5[%c0_12, %c0_13, %c0_14] : memref<1x32x64xf32, #tpu.memory_space<vmem>>, vector<1x32x64xf32>
    %59 = vector.shape_cast %58 : vector<1x32x64xf32> to vector<32x64xf32>
    %cst_15 = arith.constant dense<0.000000e+00> : vector<64x64xf32>
    %60 = tpu.matmul %57, %59, %cst_15 {dimension_numbers = #tpu.dot_dimension_numbers<[1], [0], [0], [1], [0, 0, 1, 1], [], []>} : vector<64x32xf32>, vector<32x64xf32>, vector<64x64xf32> -> vector<64x64xf32>
    %c0_16 = arith.constant 0 : index
    %c0_17 = arith.constant 0 : index
    %c0_18 = arith.constant 0 : index
    %61 = vector.load %arg6[%c0_16, %c0_17, %c0_18] : memref<1x1x64xf32, #tpu.memory_space<vmem>>, vector<1x1x64xf32>
    %62 = vector.shape_cast %61 : vector<1x1x64xf32> to vector<1x64xf32>
    %63 = vector.broadcast %62 : vector<1x64xf32> to vector<64x64xf32>
    %64 = arith.addf %60, %63 : vector<64x64xf32>
    %65 = vector.extract_strided_slice %64 {offsets = [0, 0], sizes = [64, 32], strides = [1, 1]} : vector<64x64xf32> to vector<64x32xf32>
    %cst_19 = arith.constant 0.000000e+00 : f32
    %66 = vector.broadcast %cst_19 : f32 to vector<64x32xf32>
    %67 = arith.maximumf %65, %66 : vector<64x32xf32>
    %68 = vector.extract_strided_slice %64 {offsets = [0, 32], sizes = [64, 32], strides = [1, 1]} : vector<64x64xf32> to vector<64x32xf32>
    %69 = arith.negf %68 : vector<64x32xf32>
    %70 = math.exp %69 : vector<64x32xf32>
    %cst_20 = arith.constant 1.000000e+00 : f32
    %71 = vector.broadcast %cst_20 : f32 to vector<64x32xf32>
    %72 = arith.addf %71, %70 : vector<64x32xf32>
    %73 = arith.divf %71, %72 : vector<64x32xf32>
    %74 = arith.mulf %73, %57 : vector<64x32xf32>
    %cst_21 = arith.constant 1.000000e+00 : f32
    %75 = vector.broadcast %cst_21 : f32 to vector<64x32xf32>
    %76 = arith.subf %75, %73 : vector<64x32xf32>
    %77 = arith.mulf %76, %67 : vector<64x32xf32>
    %78 = arith.addf %74, %77 : vector<64x32xf32>
    %c0_22 = arith.constant 0 : index
    %c0_23 = arith.constant 0 : index
    %79 = vector.load %arg7[%c0_22, %c0_23] : memref<32x16xf32, #tpu.memory_space<vmem>>, vector<32x16xf32>
    %cst_24 = arith.constant dense<0.000000e+00> : vector<64x16xf32>
    %80 = tpu.matmul %78, %79, %cst_24 {dimension_numbers = #tpu.dot_dimension_numbers<[1], [0], [0], [1], [0, 0, 1, 1], [], []>} : vector<64x32xf32>, vector<32x16xf32>, vector<64x16xf32> -> vector<64x16xf32>
    %c0_25 = arith.constant 0 : index
    %c0_26 = arith.constant 0 : index
    %81 = vector.load %arg8[%c0_25, %c0_26] : memref<1x16xf32, #tpu.memory_space<vmem>>, vector<1x16xf32>
    %82 = vector.broadcast %81 : vector<1x16xf32> to vector<64x16xf32>
    %83 = arith.addf %80, %82 : vector<64x16xf32>
    %c0_27 = arith.constant 0 : index
    %c0_28 = arith.constant 0 : index
    %84 = vector.load %arg9[%c0_27, %c0_28] : memref<64x16xf32, #tpu.memory_space<vmem>>, vector<64x16xf32>
    tpu.vector_store %arg9[%c0_27, %c0_28], %83 {strides = array<i32>} : memref<64x16xf32, #tpu.memory_space<vmem>>, vector<64x16xf32>,
    return
  }
}

</mosaic_0001>

<bundles_post_ra>
// kernel: tpu_custom_call.1
= control target key start
LH: loop header
LB: loop body
LE: loop exit
PB: predicated region body
PF: predicated region fallthrough
CT: control target
= control target key end

     0   :  { %14 = vsyncpa [#allocation3], 0  ;;  %s2229_s0 = inlined_call_operand.hbm [shape: f32[64,64], index: 0, kind: input, shape index: {}]   ;;  %s2230_s1 = inlined_call_operand.hbm [shape: f32[64,216], index: 1, kind: input, shape index: {}]   ;;  %s2231_s2 = inlined_call_operand.vmem [shape: f32[1,8], index: 2, kind: input, shape index: {}]   ;;  %s2232_s3 = inlined_call_operand.vmem [shape: f32[1,8], index: 3, kind: input, shape index: {}]   ;;  %s2233_s4 = inlined_call_operand.vmem [shape: f32[1,16], index: 4, kind: input, shape index: {}]   ;;  %s2234_s5 = inlined_call_operand.vmem [shape: f32[1,32,64], index: 5, kind: input, shape index: {}]   ;;  %s2235_s6 = inlined_call_operand.vmem [shape: f32[1,1,64], index: 6, kind: input, shape index: {}]   ;;  %s2236_s7 = inlined_call_operand.vmem [shape: f32[32,16], index: 7, kind: input, shape index: {}]   ;;  %s2237_s8 = inlined_call_operand.vmem [shape: f32[1,16], index: 8, kind: input, shape index: {}]   ;;  %s2238_s9 = inlined_call_operand.vmem [shape: f32[64,16], index: 9, kind: output, shape index: {}]  }
   0x1   :  { %15 = vsyncpa [#allocation5], 0  ;;  %s1552_s30 = smov [#allocation2]   ;;  %s1504_s13 = scalar_lea.hbm %s2229_s0, 1024 }
   0x2   :  { %s21_s10 = sshll.u32 %s1552_s30, 4  ;;  %p1505_p0 = scmp.ne.s32.totalorder %s2229_s0, %s1504_s13  ;;  %s22_s10 = int_to_ptr.vmem [resolvable:$true] %s21_s10 }
   0x3   :  { %p1508_p1 = scmp.lt.u32.totalorder %s1504_s13, %s2229_s0 }
   0x5   :  { %p1510_p2 = pnand %p1508_p1, %p1505_p0 }
   0x7   :  { %1513 = shalt.err (!%p1510_p2)
}
   0x8   :  { %s1514_s18 = scalar_lea.vmem %s22_s10, 1024  ;;  %p1519_p4 = scmp.lt.s32.totalorder %s22_s10, %s22_s10 }
   0x9   :  { %p1515_p3 = scmp.ne.s32.totalorder %s22_s10, %s1514_s18  ;;  %p1520_p5 = scmp.lt.s32.totalorder %s1514_s18, %s1514_s18 }
   0xb   :  { %p1521_p6 = por %p1520_p5, %p1519_p4 }
   0xd   :  { %p1522_p7 = pnand %p1521_p6, %p1515_p3 }
   0xf   :  { %1525 = shalt.err (!%p1522_p7)
}
  0x10   :  { %s1553_s19 = smov 128   ;;  %s1554_s20 = smov 8  }
  0x11   :  { %27 = dma.hbm_to_vmem [thread:$0]  %s2229_s0, 1024, %s22_s10, [#allocation3], %s1553_s19, %s1553_s19, %s1554_s20  }
  0x12   :  { %s1555_s23 = smov [#allocation4]   ;;  %s1526_s27 = scalar_lea.hbm %s2230_s1, 2048 }
  0x13   :  { %s33_s24 = sshll.u32 %s1555_s23, 4  ;;  %p1527_p8 = scmp.ne.s32.totalorder %s2230_s1, %s1526_s27  ;;  %s34_s24 = int_to_ptr.vmem [resolvable:$true] %s33_s24 }
  0x14   :  { %p1530_p9 = scmp.lt.u32.totalorder %s1526_s27, %s2230_s1 }
  0x16   :  { %p1532_p10 = pnand %p1530_p9, %p1527_p8 }
  0x18   :  { %1535 = shalt.err (!%p1532_p10)
}
  0x19   :  { %s1536_s12 = scalar_lea.vmem %s34_s24, 2048  ;;  %p1541_p12 = scmp.lt.s32.totalorder %s34_s24, %s34_s24 }
  0x1a   :  { %p1537_p11 = scmp.ne.s32.totalorder %s34_s24, %s1536_s12  ;;  %p1542_p13 = scmp.lt.s32.totalorder %s1536_s12, %s1536_s12 }
  0x1c   :  { %p1543_p0 = por %p1542_p13, %p1541_p12 }
  0x1e   :  { %p1544_p1 = pnand %p1543_p0, %p1537_p11 }
  0x20   :  { %1547 = shalt.err (!%p1544_p1)
}
  0x21   :  { %s1556_s0 = smov 256   ;;  %s1557_s10 = smov 16  }
  0x22   :  { %39 = dma.hbm_to_vmem [thread:$0]  %s2230_s1, 2048, %s34_s24, [#allocation5], %s1556_s0, %s1556_s0, %s1557_s10  }
  0x23   :  { %1548 = dma.done.wait [#allocation3], 1024  }
  0x24   :  { %1549 = vsyncadd [#allocation3], 4294966272 }
  0x25   :  { %1550 = dma.done.wait [#allocation5], 2048  }
  0x26   :  { %1551 = vsyncadd [#allocation5], 4294965248  ;;  %v1558_v0 = vmov 0.0   ;;  %v69_v1 = vld [vmem:[#allocation4 + $0x8] sm:$0xff]  ;;  %v71_v2 = vld [vmem:[#allocation4 + $0x18] sm:$0xff]  ;;  %s1559_s18 = smov 120  }
  0x27   :  { %173 = vmatprep.mubr.f32.mxu0 %v1558_v0  ;;  %v68_v3 = vld [vmem:[#allocation4] sm:$0xff]  ;;  %v1422_v4 = vpack.c.bf16 %v71_v2, %v69_v1  ;;  %v70_v5 = vld [vmem:[#allocation4 + $0x10] sm:$0xff]  ;;  %v73_v6 = vld [vmem:[#allocation4 + $0x28] sm:$0xff]  ;;  %s1560_s19 = smov 64   ;;  %vm84_vm0 = vcmask 523264   ;;  %s1563_s20 = smov 88  }
  0x28   :  { %v75_v7 = vld [vmem:[#allocation4 + $0x38] sm:$0xff]  ;;  %v1424_v8 = vpack.c.bf16 %v70_v5, %v68_v3  ;;  %v72_v10 = vld [vmem:[#allocation4 + $0x20] sm:$0xff]  ;;  %v74_v11 = vld [vmem:[#allocation4 + $0x30] sm:$0xff]  ;;  %s1564_s21 = smov 96   ;;  %s1565_s22 = smov 80   ;;  %vm831_vm1 = vcmask 195584  }
  0x29   :  { %v1426_v9 = vpack.c.bf16 %v75_v7, %v73_v6  ;;  %v77_v12 = vld [vmem:[#allocation4 + $0x48] sm:$0xff]  ;;  %1423 = vmatprep.subr.bf16.mxu0 %v1422_v4  ;;  %v79_v13 = vld [vmem:[#allocation4 + $0x58] sm:$0xff]  ;;  %v1428_v14 = vpack.c.bf16 %v74_v11, %v72_v10  ;;  %v76_v16 = vld [vmem:[#allocation4 + $0x40] sm:$0xff]  ;;  %s1566_s23 = smov 48   ;;  %s1567_s24 = smov 72   ;;  %vm848_vm2 = vcmask 64512  }
  0x2a   :  { %1425 = vmatpush1.bf16.msra.mxu0 %v1424_v8  ;;  %v1430_v15 = vpack.c.bf16 %v79_v13, %v77_v12  ;;  %v78_v17 = vld [vmem:[#allocation4 + $0x50] sm:$0xff]  ;;  %v81_v18 = vld [vmem:[#allocation4 + $0x68] sm:$0xff]  ;;  %v83_v19 = vld [vmem:[#allocation4 + $0x78] sm:$0xff]  ;;  %vm857_vm3 = vcmask 130048   ;;  %vm877_vm4 = vcmask 261120  }
  0x2b   :  { %1427 = vmatprep.subr.bf16.mxu0 %v1426_v9  ;;  %v1432_v20 = vpack.c.bf16 %v78_v17, %v76_v16  ;;  %v1331_v21 = vld [vmem:[%s2233_s4] ss:$0 sm:$0xff]  ;;  %v1434_v23 = vpack.c.bf16 %v83_v19, %v81_v18  ;;  %v82_v25 = vld [vmem:[#allocation4 + $0x70] sm:$0xff]  ;;  %v61_v28 = vld [vmem:[#allocation2 + $0x8] sm:$0xff]  ;;  %s1562_s4 = smov 104  }
  0x2c   :  { %v1330_v22 = vld [vmem:[%s2232_s3] ss:$0 sm:$0xff]  ;;  %716 = vrot.lane.b32.xlu0 %v1331_v21, %s1559_s18  ;;  %v62_v29 = vld [vmem:[#allocation2 + $0x10] sm:$0xff]  ;;  %v63_v30 = vld [vmem:[#allocation2 + $0x18] sm:$0xff]  ;;  %s1561_s3 = smov 112  }
  0x2d   :  { %v80_v24 = vld [vmem:[#allocation4 + $0x60] sm:$0xff]  ;;  %483 = vrot.lane.b32.xlu1 %v1330_v22, %s1560_s19  ;;  %v65_v32 = vld [vmem:[#allocation2 + $0x28] sm:$0xff]  ;;  %v66_v33 = vld [vmem:[#allocation2 + $0x30] sm:$0xff] }
  0x2e   :  { %1429 = vmatpush1.bf16.msra.mxu0 %v1428_v14  ;;  %v1436_v26 = vpack.c.bf16 %v82_v25, %v80_v24  ;;  %v60_v27 = vld [vmem:[#allocation2] sm:$0xff]  ;;  %v67_v34 = vld [vmem:[#allocation2 + $0x38] sm:$0xff] }
  0x2f   :  { %1431 = vmatprep.subr.bf16.mxu0 %v1430_v15  ;;  %v64_v31 = vld [vmem:[#allocation2 + $0x20] sm:$0xff] }
  0x32   :  { %1433 = vmatpush1.bf16.msra.mxu0 %v1432_v20 }
  0x33   :  { %1435 = vmatprep.subr.bf16.mxu0 %v1434_v23 }
  0x36   :  { %1437 = vmatpush1.bf16.msra.mxu0 %v1436_v26 }
  0x39   :  { %1321 = vmatmul.mubr.msk.f32.vlgmr.msra.gmra.mrb[0].mxu0 %vm84_vm0, %v60_v27 }
  0x3a   :  { %179 = vmatprep.mubr.f32.mxu0 %v1558_v0 }
  0x3d   :  { %1322 = vmatmul.mubr.msk.f32.gmra.mrb[2].mxu0 %vm84_vm0, %v61_v28 }
  0x3e   :  { %185 = vmatprep.mubr.f32.mxu0 %v1558_v0 }
  0x41   :  { %1323 = vmatmul.mubr.msk.f32.gmra.mrb[4].mxu0 %vm84_vm0, %v62_v29 }
  0x42   :  { %191 = vmatprep.mubr.f32.mxu0 %v1558_v0 }
  0x45   :  { %1324 = vmatmul.mubr.msk.f32.gmra.mrb[6].mxu0 %vm84_vm0, %v63_v30 }
  0x46   :  { %197 = vmatprep.mubr.f32.mxu0 %v1558_v0 }
  0x49   :  { %1325 = vmatmul.mubr.msk.f32.gmra.mrb[8].mxu0 %vm84_vm0, %v64_v31 }
  0x4a   :  { %203 = vmatprep.mubr.f32.mxu0 %v1558_v0 }
  0x4d   :  { %1326 = vmatmul.mubr.msk.f32.gmra.mrb[10].mxu0 %vm84_vm0, %v65_v32 }
  0x4e   :  { %209 = vmatprep.mubr.f32.mxu0 %v1558_v0 }
  0x51   :  { %1327 = vmatmul.mubr.msk.f32.gmra.mrb[12].mxu0 %vm84_vm0, %v66_v33 }
  0x52   :  { %215 = vmatprep.mubr.f32.mxu0 %v1558_v0 }
  0x55   :  { %1328 = vmatmul.mubr.msk.f32.gmra.mrb[14].mxu0 %vm84_vm0, %v67_v34 }
  0x9e   :  { %v1804_v51 = vpop.permute.xlu0 %716 }
  0x9f   :  { %v1806_v52 = vpop.permute.xlu1 %483 }
 0x10c   :  { %v1660_v35 = vpop.f32.mrb[0].mxu0 }
 0x10d   :  { %262 = vrot.lane.b32.xlu1 %v1660_v35, %s1561_s3  ;;  %230 = vrot.lane.b32.xlu0 %v1660_v35, %s1559_s18  ;;  %v1666_v36 = vpop.f32.mrb[1].mxu0 }
 0x110   :  { %v1668_v37 = vpop.f32.mrb[2].mxu0 }
 0x111   :  { %294 = vrot.lane.b32.xlu1 %v1660_v35, %s1562_s4  ;;  %358 = vrot.lane.b32.xlu0 %v1660_v35, %s1563_s20  ;;  %v1674_v38 = vpop.f32.mrb[3].mxu0 }
 0x114   :  { %v1676_v39 = vpop.f32.mrb[4].mxu0 }
 0x115   :  { %326 = vrot.lane.b32.xlu1 %v1660_v35, %s1564_s21  ;;  %390 = vrot.lane.b32.xlu0 %v1660_v35, %s1565_s22  ;;  %v1682_v40 = vpop.f32.mrb[5].mxu0 }
 0x118   :  { %v1684_v41 = vpop.f32.mrb[6].mxu0 }
 0x119   :  { %550 = vrot.lane.b32.xlu0 %v1666_v36, %s1564_s21  ;;  %510 = vrot.lane.b32.xlu1 %v1666_v36, %s1561_s3  ;;  %v1690_v42 = vpop.f32.mrb[7].mxu0 }
 0x11c   :  { %v1692_v43 = vpop.f32.mrb[8].mxu0 }
 0x11d   :  { %630 = vrot.lane.b32.xlu0 %v1666_v36, %s1560_s19  ;;  %590 = vrot.lane.b32.xlu1 %v1666_v36, %s1565_s22  ;;  %v1698_v44 = vpop.f32.mrb[9].mxu0 }
 0x120   :  { %v1700_v45 = vpop.f32.mrb[10].mxu0 }
 0x121   :  { %670 = vrot.lane.b32.xlu1 %v1666_v36, %s1566_s23  ;;  %232 = vrot.lane.b32.xlu0 %v1668_v37, %s1559_s18  ;;  %v1706_v46 = vpop.f32.mrb[11].mxu0 }
 0x124   :  { %v1708_v47 = vpop.f32.mrb[12].mxu0 }
 0x125   :  { %328 = vrot.lane.b32.xlu1 %v1668_v37, %s1564_s21  ;;  %264 = vrot.lane.b32.xlu0 %v1668_v37, %s1561_s3  ;;  %v1714_v48 = vpop.f32.mrb[13].mxu0 }
 0x128   :  { %v1716_v49 = vpop.f32.mrb[14].mxu0 }
 0x129   :  { %360 = vrot.lane.b32.xlu1 %v1668_v37, %s1563_s20  ;;  %296 = vrot.lane.b32.xlu0 %v1668_v37, %s1562_s4  ;;  %v1722_v50 = vpop.f32.mrb[15].mxu0 }
 0x12d   :  { %392 = vrot.lane.b32.xlu0 %v1668_v37, %s1565_s22  ;;  %512 = vrot.lane.b32.xlu1 %v1674_v38, %s1561_s3 }
 0x131   :  { %552 = vrot.lane.b32.xlu1 %v1674_v38, %s1564_s21  ;;  %234 = vrot.lane.b32.xlu0 %v1676_v39, %s1559_s18 }
 0x135   :  { %592 = vrot.lane.b32.xlu1 %v1674_v38, %s1565_s22  ;;  %266 = vrot.lane.b32.xlu0 %v1676_v39, %s1561_s3 }
 0x139   :  { %632 = vrot.lane.b32.xlu1 %v1674_v38, %s1560_s19  ;;  %362 = vrot.lane.b32.xlu0 %v1676_v39, %s1563_s20 }
 0x13d   :  { %672 = vrot.lane.b32.xlu1 %v1674_v38, %s1566_s23  ;;  %394 = vrot.lane.b32.xlu0 %v1676_v39, %s1565_s22 }
 0x141   :  { %298 = vrot.lane.b32.xlu1 %v1676_v39, %s1562_s4  ;;  %514 = vrot.lane.b32.xlu0 %v1682_v40, %s1561_s3 }
 0x145   :  { %330 = vrot.lane.b32.xlu1 %v1676_v39, %s1564_s21  ;;  %594 = vrot.lane.b32.xlu0 %v1682_v40, %s1565_s22 }
 0x149   :  { %554 = vrot.lane.b32.xlu1 %v1682_v40, %s1564_s21  ;;  %268 = vrot.lane.b32.xlu0 %v1684_v41, %s1561_s3 }
 0x14d   :  { %634 = vrot.lane.b32.xlu1 %v1682_v40, %s1560_s19  ;;  %300 = vrot.lane.b32.xlu0 %v1684_v41, %s1562_s4 }
 0x151   :  { %674 = vrot.lane.b32.xlu1 %v1682_v40, %s1566_s23  ;;  %396 = vrot.lane.b32.xlu0 %v1684_v41, %s1565_s22 }
 0x155   :  { %236 = vrot.lane.b32.xlu1 %v1684_v41, %s1559_s18  ;;  %516 = vrot.lane.b32.xlu0 %v1690_v42, %s1561_s3 }
 0x159   :  { %332 = vrot.lane.b32.xlu1 %v1684_v41, %s1564_s21  ;;  %556 = vrot.lane.b32.xlu0 %v1690_v42, %s1564_s21 }
 0x15d   :  { %364 = vrot.lane.b32.xlu1 %v1684_v41, %s1563_s20  ;;  %596 = vrot.lane.b32.xlu0 %v1690_v42, %s1565_s22 }
 0x161   :  { %636 = vrot.lane.b32.xlu1 %v1690_v42, %s1560_s19  ;;  %238 = vrot.lane.b32.xlu0 %v1692_v43, %s1559_s18 }
 0x165   :  { %676 = vrot.lane.b32.xlu1 %v1690_v42, %s1566_s23  ;;  %270 = vrot.lane.b32.xlu0 %v1692_v43, %s1561_s3 }
 0x169   :  { %302 = vrot.lane.b32.xlu1 %v1692_v43, %s1562_s4  ;;  %558 = vrot.lane.b32.xlu0 %v1698_v44, %s1564_s21 }
 0x16d   :  { %334 = vrot.lane.b32.xlu1 %v1692_v43, %s1564_s21  ;;  %598 = vrot.lane.b32.xlu0 %v1698_v44, %s1565_s22 }
 0x171   :  { %366 = vrot.lane.b32.xlu1 %v1692_v43, %s1563_s20  ;;  %272 = vrot.lane.b32.xlu0 %v1700_v45, %s1561_s3 }
 0x175   :  { %398 = vrot.lane.b32.xlu1 %v1692_v43, %s1565_s22  ;;  %304 = vrot.lane.b32.xlu0 %v1700_v45, %s1562_s4 }
 0x179   :  { %518 = vrot.lane.b32.xlu1 %v1698_v44, %s1561_s3  ;;  %560 = vrot.lane.b32.xlu0 %v1706_v46, %s1564_s21 }
 0x17d   :  { %638 = vrot.lane.b32.xlu1 %v1698_v44, %s1560_s19  ;;  %600 = vrot.lane.b32.xlu0 %v1706_v46, %s1565_s22 }
 0x17f   :  { %v1812_v53 = vpop.permute.xlu1 %262  ;;  %v1814_v54 = vpop.permute.xlu0 %230 }
 0x180   :  { %v254_v19 = vmax.f32 %v1660_v35, %v1814_v54 }
 0x181   :  { %678 = vrot.lane.b32.xlu1 %v1698_v44, %s1566_s23  ;;  %242 = vrot.lane.b32.xlu0 %v1708_v47, %s1559_s18 }
 0x182   :  { %v286_v24 = vmax.f32 %v254_v19, %v1812_v53 }
 0x183   :  { %v1820_v55 = vpop.permute.xlu1 %294  ;;  %v1822_v56 = vpop.permute.xlu0 %358 }
 0x184   :  { %v318_v30 = vmax.f32 %v286_v24, %v1820_v55 }
 0x185   :  { %240 = vrot.lane.b32.xlu1 %v1700_v45, %s1559_s18  ;;  %274 = vrot.lane.b32.xlu0 %v1708_v47, %s1561_s3 }
 0x187   :  { %v1828_v57 = vpop.permute.xlu1 %326  ;;  %v1830_v58 = vpop.permute.xlu0 %390 }
 0x188   :  { %v350_v32 = vmax.f32 %v318_v30, %v1828_v57  ;;  %v867_v57 = vld [vmem:[%s2234_s5 + $0x8] sm:$0xff] }
 0x189   :  { %336 = vrot.lane.b32.xlu1 %v1700_v45, %s1564_s21  ;;  %306 = vrot.lane.b32.xlu0 %v1708_v47, %s1562_s4 }
 0x18b   :  { %v551_v59 = vpop.permute.xlu0 %550  ;;  %v511_v60 = vpop.permute.xlu1 %510 }
 0x18c   :  { %v534_v15 = vmax.f32 %v1660_v35, %v511_v60  ;;  %v535_v16 = vmax.f32 %v1666_v36, %v511_v60  ;;  %v382_v60 = vmax.f32 %v350_v32, %v1822_v56 }
 0x18d   :  { %368 = vrot.lane.b32.xlu1 %v1700_v45, %s1563_s20  ;;  %338 = vrot.lane.b32.xlu0 %v1708_v47, %s1564_s21 }
 0x18e   :  { %v574_v20 = vmax.f32 %v534_v15, %v551_v59  ;;  %v575_v21 = vmax.f32 %v535_v16, %v551_v59 }
 0x18f   :  { %v1840_v61 = vpop.permute.xlu0 %630  ;;  %v1842_v62 = vpop.permute.xlu1 %590 }
 0x190   :  { %v614_v26 = vmax.f32 %v574_v20, %v1842_v62  ;;  %v615_v27 = vmax.f32 %v575_v21, %v1842_v62 }
 0x191   :  { %400 = vrot.lane.b32.xlu1 %v1700_v45, %s1565_s22  ;;  %370 = vrot.lane.b32.xlu0 %v1708_v47, %s1563_s20 }
 0x192   :  { %v654_v36 = vmax.f32 %v614_v26, %v1840_v61  ;;  %v655_v53 = vmax.f32 %v615_v27, %v1840_v61 }
 0x193   :  { %v1848_v63 = vpop.permute.xlu1 %670  ;;  %v233_v0 = vpop.permute.xlu0 %232 }
 0x194   :  { %v255_v25 = vmax.f32 %v1668_v37, %v233_v0 }
 0x195   :  { %520 = vrot.lane.b32.xlu1 %v1706_v46, %s1561_s3  ;;  %402 = vrot.lane.b32.xlu0 %v1708_v47, %s1565_s22 }
 0x197   :  { %v1854_v1 = vpop.permute.xlu1 %328  ;;  %v265_v2 = vpop.permute.xlu0 %264 }
 0x198   :  { %v287_v31 = vmax.f32 %v255_v25, %v265_v2  ;;  %v694_v2 = vmax.f32 %v654_v36, %v1848_v63 }
 0x199   :  { %640 = vrot.lane.b32.xlu1 %v1706_v46, %s1560_s19  ;;  %562 = vrot.lane.b32.xlu0 %v1714_v48, %s1564_s21 }
 0x19a   :  { %v719_v24 = vadd.f32 %v1804_v51, %v694_v2 }
 0x19b   :  { %v1860_v3 = vpop.permute.xlu1 %360  ;;  %v297_v4 = vpop.permute.xlu0 %296 }
 0x19c   :  { %v319_v33 = vmax.f32 %v287_v31, %v297_v4  ;;  %v695_v4 = vmax.f32 %v655_v53, %v1848_v63  ;;  %v868_v63 = vld [vmem:[%s2234_s5 + $0x10] sm:$0xff] }
 0x19d   :  { %680 = vrot.lane.b32.xlu1 %v1706_v46, %s1566_s23  ;;  %602 = vrot.lane.b32.xlu0 %v1714_v48, %s1565_s22 }
 0x19e   :  { %v351_v61 = vmax.f32 %v319_v33, %v1854_v1  ;;  %v720_v25 = vadd.f32 %v1804_v51, %v695_v4 }
 0x19f   :  { %v1866_v5 = vpop.permute.xlu0 %392  ;;  %v1868_v6 = vpop.permute.xlu1 %512 }
 0x1a0   :  { %v537_v34 = vmax.f32 %v1674_v38, %v1868_v6  ;;  %v536_v62 = vmax.f32 %v1668_v37, %v1868_v6  ;;  %v736_v36 = vmax.f32 %v720_v25, 0.0 }
 0x1a1   :  { %522 = vrot.lane.b32.xlu1 %v1714_v48, %s1561_s3  ;;  %276 = vrot.lane.b32.xlu0 %v1716_v49, %s1561_s3 }
 0x1a3   :  { %v1874_v7 = vpop.permute.xlu1 %552  ;;  %v1876_v8 = vpop.permute.xlu0 %234 }
 0x1a4   :  { %v577_v59 = vmax.f32 %v537_v34, %v1874_v7  ;;  %v576_v56 = vmax.f32 %v536_v62, %v1874_v7  ;;  %v1979_v7 = vmax.f32 %v382_v60, %v1830_v58 }
 0x1a5   :  { %642 = vrot.lane.b32.xlu1 %v1714_v48, %s1560_s19  ;;  %308 = vrot.lane.b32.xlu0 %v1716_v49, %s1562_s4 }
 0x1a7   :  { %v1882_v9 = vpop.permute.xlu1 %592  ;;  %v1884_v10 = vpop.permute.xlu0 %266 }
 0x1a8   :  { %v617_v0 = vmax.f32 %v577_v59, %v1882_v9  ;;  %v616_v21 = vmax.f32 %v576_v56, %v1882_v9 }
 0x1a9   :  { %682 = vrot.lane.b32.xlu1 %v1714_v48, %s1566_s23  ;;  %340 = vrot.lane.b32.xlu0 %v1716_v49, %s1564_s21 }
 0x1ab   :  { %v1890_v11 = vpop.permute.xlu1 %632  ;;  %v1892_v12 = vpop.permute.xlu0 %362 }
 0x1ac   :  { %v657_v1 = vmax.f32 %v617_v0, %v1890_v11  ;;  %v656_v31 = vmax.f32 %v616_v21, %v1890_v11 }
 0x1ad   :  { %372 = vrot.lane.b32.xlu0 %v1716_v49, %s1563_s20  ;;  %244 = vrot.lane.b32.xlu1 %v1716_v49, %s1559_s18 }
 0x1af   :  { %v1898_v13 = vpop.permute.xlu1 %672  ;;  %v1900_v14 = vpop.permute.xlu0 %394 }
 0x1b0   :  { %v697_v27 = vmax.f32 %v657_v1, %v1898_v13  ;;  %v696_v33 = vmax.f32 %v656_v31, %v1898_v13 }
 0x1b1   :  { %564 = vrot.lane.b32.xlu0 %v1722_v50, %s1564_s21  ;;  %524 = vrot.lane.b32.xlu1 %v1722_v50, %s1561_s3 }
 0x1b2   :  { %v722_v53 = vadd.f32 %v1804_v51, %v697_v27 }
 0x1b3   :  { %v1908_v17 = vpop.permute.xlu1 %298  ;;  %v515_v18 = vpop.permute.xlu0 %514 }
 0x1b4   :  { %v538_v15 = vmax.f32 %v1676_v39, %v515_v18  ;;  %v539_v16 = vmax.f32 %v1682_v40, %v515_v18  ;;  %v869_v40 = vld [vmem:[%s2234_s5 + $0x18] sm:$0xff] }
 0x1b5   :  { %604 = vrot.lane.b32.xlu0 %v1722_v50, %s1565_s22  ;;  %644 = vrot.lane.b32.xlu1 %v1722_v50, %s1560_s19 }
 0x1b7   :  { %v1916_v22 = vpop.permute.xlu1 %330  ;;  %v1918_v23 = vpop.permute.xlu0 %594 }
 0x1b9   :  { %404 = vrot.lane.b32.xlu0 %v1716_v49, %s1565_s22  ;;  %684 = vrot.lane.b32.xlu1 %v1722_v50, %s1566_s23 }
 0x1bb   :  { %v555_v28 = vpop.permute.xlu1 %554  ;;  %v269_v29 = vpop.permute.xlu0 %268 }
 0x1bc   :  { %v578_v6 = vmax.f32 %v538_v15, %v555_v28  ;;  %v579_v18 = vmax.f32 %v539_v16, %v555_v28 }
 0x1bd   :  { %422 = vrot.lane.b32.xlu0 %v1660_v35, %s1567_s24  ;;  %424 = vrot.lane.b32.xlu1 %v1668_v37, %s1567_s24  ;;  %v866_v35 = vld [vmem:[%s2234_s5] sm:$0xff]  ;;  %v256_v37 = vmax.f32 %v1676_v39, %v1876_v8  ;;  %v383_v8 = vmax.f32 %v351_v61, %v1860_v3  ;;  %s1568_s5 = smov 24   ;;  %v738_v61 = vmax.f32 %v722_v53, 0.0 }
 0x1be   :  { %v1438_v38 = vpack.c.bf16 %v867_v57, %v866_v35  ;;  %v618_v9 = vmax.f32 %v578_v6, %v1918_v23  ;;  %v619_v32 = vmax.f32 %v579_v18, %v1918_v23 }
 0x1bf   :  { %v635_v54 = vpop.permute.xlu1 %634  ;;  %v1938_v55 = vpop.permute.xlu0 %300  ;;  %v288_v26 = vmax.f32 %v256_v37, %v1884_v10  ;;  %v486_v10 = vadd.f32 %v1806_v52, %v1979_v7  ;;  %v1999_v11 = vmax.f32 %v383_v8, %v1866_v5 }
 0x1c0   :  { %1439 = vmatprep.subr.bf16.mxu1 %v1438_v38  ;;  %v659_v60 = vmax.f32 %v619_v32, %v635_v54 }
 0x1c1   :  { %426 = vrot.lane.b32.xlu0 %v1676_v39, %s1567_s24  ;;  %428 = vrot.lane.b32.xlu1 %v1684_v41, %s1567_s24  ;;  %v1442_v39 = vpack.c.bf16 %v869_v40, %v868_v63  ;;  %v320_v3 = vmax.f32 %v288_v26, %v1908_v17  ;;  %v735_v17 = vmax.f32 %v719_v24, 0.0  ;;  %v494_v5 = vmax.f32 %v486_v10, 0.0 }
 0x1c2   :  { %1441 = vmatpush3.bf16.msra.mxu1 %v1438_v38  ;;  %v658_v38 = vmax.f32 %v618_v9, %v635_v54  ;;  %v487_v13 = vadd.f32 %v1806_v52, %v1999_v11 }
 0x1c3   :  { %v1960_v19 = vpop.permute.xlu1 %674  ;;  %v1962_v20 = vpop.permute.xlu0 %396  ;;  %1443 = vmatprep.subr.bf16.mxu1 %v1442_v39  ;;  %v352_v23 = vmax.f32 %v320_v3, %v1916_v22 }
 0x1c4   :  { %v698_v62 = vmax.f32 %v658_v38, %v1960_v19  ;;  %v495_v16 = vmax.f32 %v487_v13, 0.0 }
 0x1c5   :  { %430 = vrot.lane.b32.xlu0 %v1692_v43, %s1567_s24  ;;  %432 = vrot.lane.b32.xlu1 %v1700_v45, %s1567_s24  ;;  %v384_v22 = vmax.f32 %v352_v23, %v1892_v12 }
 0x1c6   :  { %1445 = vmatpush3.bf16.msra.mxu1 %v1442_v39 }
 0x1c7   :  { %v237_v28 = vpop.permute.xlu1 %236  ;;  %v517_v30 = vpop.permute.xlu0 %516  ;;  %v2018_v12 = vmax.f32 %v384_v22, %v1900_v14 }
 0x1c8   :  { %v257_v58 = vmax.f32 %v1684_v41, %v237_v28  ;;  %v540_v2 = vmax.f32 %v1684_v41, %v517_v30  ;;  %v541_v4 = vmax.f32 %v1690_v42, %v517_v30 }
 0x1c9   :  { %434 = vrot.lane.b32.xlu0 %v1708_v47, %s1567_s24  ;;  %436 = vrot.lane.b32.xlu1 %v1716_v49, %s1567_s24  ;;  %v488_v21 = vadd.f32 %v1806_v52, %v2018_v12 }
 0x1ca   :  { %v289_v34 = vmax.f32 %v257_v58, %v269_v29  ;;  %v721_v29 = vadd.f32 %v1804_v51, %v696_v33 }
 0x1cb   :  { %v333_v59 = vpop.permute.xlu1 %332  ;;  %v557_v35 = vpop.permute.xlu0 %556  ;;  %v496_v32 = vmax.f32 %v488_v21, 0.0 }
 0x1cc   :  { %v321_v57 = vmax.f32 %v289_v34, %v1938_v55  ;;  %v699_v55 = vmax.f32 %v659_v60, %v1960_v19  ;;  %v580_v56 = vmax.f32 %v540_v2, %v557_v35  ;;  %v581_v37 = vmax.f32 %v541_v4, %v557_v35 }
 0x1cd   :  { %801 = vrot.lane.b32.xlu0 %v736_v36, %s1568_s5  ;;  %799 = vrot.lane.b32.xlu1 %v735_v17, %s1568_s5  ;;  %v737_v1 = vmax.f32 %v721_v29, 0.0  ;;  %v723_v19 = vadd.f32 %v1804_v51, %v698_v62 }
 0x1ce   :  { %v353_v15 = vmax.f32 %v321_v57, %v333_v59  ;;  %v724_v63 = vadd.f32 %v1804_v51, %v699_v55 }
 0x1cf   :  { %v365_v0 = vpop.permute.xlu1 %364  ;;  %v597_v54 = vpop.permute.xlu0 %596  ;;  %v739_v14 = vmax.f32 %v723_v19, 0.0 }
 0x1d0   :  { %v385_v6 = vmax.f32 %v353_v15, %v365_v0  ;;  %v620_v42 = vmax.f32 %v580_v56, %v597_v54  ;;  %v621_v18 = vmax.f32 %v581_v37, %v597_v54  ;;  %v740_v24 = vmax.f32 %v724_v63, 0.0 }
 0x1d1   :  { %759 = vrot.lane.b32.xlu0 %v494_v5, %s1567_s24  ;;  %805 = vrot.lane.b32.xlu1 %v738_v61, %s1568_s5 }
 0x1d2   :  { %v2027_v27 = vmax.f32 %v385_v6, %v1962_v20 }
 0x1d3   :  { %v637_v40 = vpop.permute.xlu1 %636  ;;  %v239_v41 = vpop.permute.xlu0 %238 }
 0x1d4   :  { %v660_v39 = vmax.f32 %v620_v42, %v637_v40  ;;  %v661_v8 = vmax.f32 %v621_v18, %v637_v40  ;;  %v489_v10 = vadd.f32 %v1806_v52, %v2027_v27  ;;  %v258_v57 = vmax.f32 %v1692_v43, %v239_v41 }
 0x1d5   :  { %803 = vrot.lane.b32.xlu0 %v737_v1, %s1568_s5  ;;  %761 = vrot.lane.b32.xlu1 %v495_v16, %s1567_s24 }
 0x1d6   :  { %v497_v36 = vmax.f32 %v489_v10, 0.0 }
 0x1d7   :  { %v677_v25 = vpop.permute.xlu1 %676  ;;  %v271_v26 = vpop.permute.xlu0 %270 }
 0x1d8   :  { %v700_v28 = vmax.f32 %v660_v39, %v677_v25  ;;  %v701_v30 = vmax.f32 %v661_v8, %v677_v25  ;;  %v290_v5 = vmax.f32 %v258_v57, %v271_v26 }
 0x1d9   :  { %809 = vrot.lane.b32.xlu0 %v740_v24, %s1568_s5  ;;  %807 = vrot.lane.b32.xlu1 %v739_v14, %s1568_s5 }
 0x1da   :  { %v726_v31 = vadd.f32 %v1804_v51, %v701_v30  ;;  %v725_v58 = vadd.f32 %v1804_v51, %v700_v28 }
 0x1db   :  { %v303_v3 = vpop.permute.xlu1 %302  ;;  %v559_v9 = vpop.permute.xlu0 %558 }
 0x1dc   :  { %v742_v33 = vmax.f32 %v726_v31, 0.0  ;;  %v741_v20 = vmax.f32 %v725_v58, 0.0  ;;  %v322_v61 = vmax.f32 %v290_v5, %v303_v3 }
 0x1dd   :  { %763 = vrot.lane.b32.xlu0 %v496_v32, %s1567_s24 }
 0x1de   :  { %813 = vrot.lane.b32.xlu1 %v742_v33, %s1568_s5 }
 0x1df   :  { %v335_v34 = vpop.permute.xlu1 %334  ;;  %v599_v17 = vpop.permute.xlu0 %598 }
 0x1e0   :  { %v354_v54 = vmax.f32 %v322_v61, %v335_v34 }
 0x1e1   :  { %811 = vrot.lane.b32.xlu0 %v741_v20, %s1568_s5 }
 0x1e2   :  { %765 = vrot.lane.b32.xlu1 %v497_v36, %s1567_s24 }
 0x1e3   :  { %v367_v53 = vpop.permute.xlu1 %366  ;;  %v273_v23 = vpop.permute.xlu0 %272 }
 0x1e4   :  { %v386_v15 = vmax.f32 %v354_v54, %v367_v53 }
 0x1e7   :  { %v399_v59 = vpop.permute.xlu1 %398  ;;  %v305_v35 = vpop.permute.xlu0 %304 }
 0x1e8   :  { %v2042_v19 = vmax.f32 %v386_v15, %v399_v59 }
 0x1ea   :  { %v490_v42 = vadd.f32 %v1806_v52, %v2042_v19 }
 0x1eb   :  { %v519_v38 = vpop.permute.xlu1 %518  ;;  %v561_v60 = vpop.permute.xlu0 %560 }
 0x1ec   :  { %v542_v13 = vmax.f32 %v1692_v43, %v519_v38  ;;  %v543_v29 = vmax.f32 %v1698_v44, %v519_v38  ;;  %v498_v14 = vmax.f32 %v490_v42, 0.0 }
 0x1ee   :  { %v582_v22 = vmax.f32 %v542_v13, %v559_v9  ;;  %v583_v62 = vmax.f32 %v543_v29, %v559_v9 }
 0x1ef   :  { %v639_v55 = vpop.permute.xlu1 %638  ;;  %v601_v0 = vpop.permute.xlu0 %600 }
 0x1f0   :  { %v622_v2 = vmax.f32 %v582_v22, %v599_v17  ;;  %v623_v4 = vmax.f32 %v583_v62, %v599_v17 }
 0x1f2   :  { %v662_v16 = vmax.f32 %v622_v2, %v639_v55  ;;  %v663_v56 = vmax.f32 %v623_v4, %v639_v55 }
 0x1f3   :  { %v679_v37 = vpop.permute.xlu1 %678  ;;  %v243_v1 = vpop.permute.xlu0 %242 }
 0x1f4   :  { %v702_v63 = vmax.f32 %v662_v16, %v679_v37  ;;  %v703_v40 = vmax.f32 %v663_v56, %v679_v37 }
 0x1f6   :  { %v727_v43 = vadd.f32 %v1804_v51, %v702_v63  ;;  %v728_v44 = vadd.f32 %v1804_v51, %v703_v40 }
 0x1f7   :  { %v241_v41 = vpop.permute.xlu1 %240  ;;  %v275_v6 = vpop.permute.xlu0 %274 }
 0x1f8   :  { %v743_v18 = vmax.f32 %v727_v43, 0.0  ;;  %v744_v39 = vmax.f32 %v728_v44, 0.0  ;;  %v259_v24 = vmax.f32 %v1700_v45, %v241_v41 }
 0x1fa   :  { %817 = vrot.lane.b32.xlu0 %v744_v39, %s1568_s5  ;;  %815 = vrot.lane.b32.xlu1 %v743_v18, %s1568_s5  ;;  %v291_v28 = vmax.f32 %v259_v24, %v273_v23 }
 0x1fb   :  { %v337_v8 = vpop.permute.xlu1 %336  ;;  %v307_v21 = vpop.permute.xlu0 %306 }
 0x1fc   :  { %v323_v58 = vmax.f32 %v291_v28, %v305_v35 }
 0x1fe   :  { %767 = vrot.lane.b32.xlu0 %v498_v14, %s1567_s24  ;;  %v355_v33 = vmax.f32 %v323_v58, %v337_v8 }
 0x1ff   :  { %v369_v25 = vpop.permute.xlu1 %368  ;;  %v339_v26 = vpop.permute.xlu0 %338 }
 0x200   :  { %v387_v57 = vmax.f32 %v355_v33, %v369_v25 }
 0x203   :  { %v401_v30 = vpop.permute.xlu1 %400  ;;  %v371_v31 = vpop.permute.xlu0 %370 }
 0x204   :  { %v2054_v23 = vmax.f32 %v387_v57, %v401_v30 }
 0x206   :  { %v491_v62 = vadd.f32 %v1806_v52, %v2054_v23 }
 0x207   :  { %v521_v3 = vpop.permute.xlu1 %520  ;;  %v403_v9 = vpop.permute.xlu0 %402 }
 0x208   :  { %v544_v32 = vmax.f32 %v1700_v45, %v521_v3  ;;  %v545_v10 = vmax.f32 %v1706_v46, %v521_v3  ;;  %v260_v45 = vmax.f32 %v1708_v47, %v243_v1  ;;  %v499_v43 = vmax.f32 %v491_v62, 0.0 }
 0x20a   :  { %v584_v20 = vmax.f32 %v544_v32, %v561_v60  ;;  %v585_v34 = vmax.f32 %v545_v10, %v561_v60  ;;  %v292_v60 = vmax.f32 %v260_v45, %v275_v6 }
 0x20b   :  { %v641_v17 = vpop.permute.xlu1 %640  ;;  %v563_v36 = vpop.permute.xlu0 %562 }
 0x20c   :  { %v624_v53 = vmax.f32 %v584_v20, %v601_v0  ;;  %v625_v59 = vmax.f32 %v585_v34, %v601_v0  ;;  %v324_v16 = vmax.f32 %v292_v60, %v307_v21 }
 0x20e   :  { %v664_v38 = vmax.f32 %v624_v53, %v641_v17  ;;  %v665_v5 = vmax.f32 %v625_v59, %v641_v17  ;;  %v356_v40 = vmax.f32 %v324_v16, %v339_v26 }
 0x20f   :  { %v681_v13 = vpop.permute.xlu1 %680  ;;  %v603_v35 = vpop.permute.xlu0 %602 }
 0x210   :  { %v704_v29 = vmax.f32 %v664_v38, %v681_v13  ;;  %v705_v61 = vmax.f32 %v665_v5, %v681_v13  ;;  %v388_v6 = vmax.f32 %v356_v40, %v371_v31 }
 0x212   :  { %v729_v46 = vadd.f32 %v1804_v51, %v704_v29  ;;  %v730_v22 = vadd.f32 %v1804_v51, %v705_v61  ;;  %v420_v39 = vmax.f32 %v388_v6, %v403_v9 }
 0x213   :  { %v523_v55 = vpop.permute.xlu1 %522  ;;  %v277_v0 = vpop.permute.xlu0 %276 }
 0x214   :  { %v745_v54 = vmax.f32 %v729_v46, 0.0  ;;  %v746_v2 = vmax.f32 %v730_v22, 0.0  ;;  %v546_v4 = vmax.f32 %v1708_v47, %v523_v55  ;;  %v547_v15 = vmax.f32 %v1714_v48, %v523_v55 }
 0x215   :  { %v492_v26 = vadd.f32 %v1806_v52, %v420_v39 }
 0x216   :  { %v586_v56 = vmax.f32 %v546_v4, %v563_v36  ;;  %v587_v37 = vmax.f32 %v547_v15, %v563_v36  ;;  %819 = vrot.lane.b32.xlu0 %v745_v54, %s1568_s5  ;;  %821 = vrot.lane.b32.xlu1 %v746_v2, %s1568_s5 }
 0x217   :  { %v643_v1 = vpop.permute.xlu1 %642  ;;  %v309_v63 = vpop.permute.xlu0 %308  ;;  %v500_v10 = vmax.f32 %v492_v26, 0.0 }
 0x218   :  { %v626_v44 = vmax.f32 %v586_v56, %v603_v35  ;;  %v627_v41 = vmax.f32 %v587_v37, %v603_v35 }
 0x21a   :  { %v666_v42 = vmax.f32 %v626_v44, %v643_v1  ;;  %v667_v18 = vmax.f32 %v627_v41, %v643_v1  ;;  %769 = vrot.lane.b32.xlu1 %v499_v43, %s1567_s24  ;;  %v1329_v1 = vld [vmem:[%s2231_s2] ss:$0 sm:$0xff]  ;;  %s1569_s2 = smov 32  }
 0x21b   :  { %v683_v47 = vpop.permute.xlu1 %682  ;;  %v341_v48 = vpop.permute.xlu0 %340 }
 0x21c   :  { %v706_v8 = vmax.f32 %v666_v42, %v683_v47  ;;  %v707_v21 = vmax.f32 %v667_v18, %v683_v47 }
 0x21e   :  { %v731_v14 = vadd.f32 %v1804_v51, %v706_v8  ;;  %v732_v24 = vadd.f32 %v1804_v51, %v707_v21 }
 0x21f   :  { %v373_v25 = vpop.permute.xlu0 %372  ;;  %v245_v28 = vpop.permute.xlu1 %244 }
 0x220   :  { %v747_v30 = vmax.f32 %v731_v14, 0.0  ;;  %v748_v58 = vmax.f32 %v732_v24, 0.0  ;;  %v261_v31 = vmax.f32 %v1716_v49, %v245_v28 }
 0x222   :  { %v293_v3 = vmax.f32 %v261_v31, %v277_v0  ;;  %825 = vrot.lane.b32.xlu0 %v748_v58, %s1568_s5  ;;  %823 = vrot.lane.b32.xlu1 %v747_v30, %s1568_s5 }
 0x223   :  { %v565_v9 = vpop.permute.xlu0 %564  ;;  %v525_v32 = vpop.permute.xlu1 %524 }
 0x224   :  { %v325_v33 = vmax.f32 %v293_v3, %v309_v63  ;;  %v548_v20 = vmax.f32 %v1716_v49, %v525_v32  ;;  %v549_v34 = vmax.f32 %v1722_v50, %v525_v32 }
 0x226   :  { %771 = vrot.lane.b32.xlu0 %v500_v10, %s1567_s24  ;;  %v588_v17 = vmax.f32 %v548_v20, %v565_v9  ;;  %v589_v36 = vmax.f32 %v549_v34, %v565_v9  ;;  %v357_v53 = vmax.f32 %v325_v33, %v341_v48 }
 0x227   :  { %v605_v59 = vpop.permute.xlu0 %604  ;;  %v645_v57 = vpop.permute.xlu1 %644 }
 0x228   :  { %v628_v38 = vmax.f32 %v588_v17, %v605_v59  ;;  %v629_v5 = vmax.f32 %v589_v36, %v605_v59  ;;  %v389_v29 = vmax.f32 %v357_v53, %v373_v25 }
 0x22a   :  { %v668_v13 = vmax.f32 %v628_v38, %v645_v57  ;;  %v669_v35 = vmax.f32 %v629_v5, %v645_v57 }
 0x22b   :  { %v405_v61 = vpop.permute.xlu0 %404  ;;  %v685_v45 = vpop.permute.xlu1 %684 }
 0x22c   :  { %v421_v46 = vmax.f32 %v389_v29, %v405_v61  ;;  %v708_v22 = vmax.f32 %v668_v13, %v685_v45  ;;  %v709_v60 = vmax.f32 %v669_v35, %v685_v45 }
 0x22e   :  { %v493_v49 = vadd.f32 %v1806_v52, %v421_v46  ;;  %v733_v50 = vadd.f32 %v1804_v51, %v708_v22  ;;  %v734_v54 = vadd.f32 %v1804_v51, %v709_v60 }
 0x22f   :  { %v423_v62 = vpop.permute.xlu0 %422  ;;  %v425_v55 = vpop.permute.xlu1 %424 }
 0x230   :  { %v501_v0 = vmax.f32 %v493_v49, 0.0  ;;  %v749_v2 = vmax.f32 %v733_v50, 0.0  ;;  %v750_v16 = vmax.f32 %v734_v54, 0.0  ;;  %v446_v51 = vmax.f32 %v1979_v7, %v423_v62 }
 0x231   :  { %v447_v42 = vmax.f32 %v1999_v11, %v425_v55 }
 0x232   :  { %773 = vrot.lane.b32.xlu1 %v501_v0, %s1567_s24  ;;  %827 = vrot.lane.b32.xlu0 %v749_v2, %s1568_s5  ;;  %v461_v6 = vadd.f32 %v1329_v1, %v446_v51 }
 0x233   :  { %v427_v4 = vpop.permute.xlu0 %426  ;;  %v429_v15 = vpop.permute.xlu1 %428  ;;  %v462_v21 = vadd.f32 %v1329_v1, %v447_v42 }
 0x234   :  { %v469_v8 = vmax.f32 %v461_v6, 0.0  ;;  %v448_v28 = vmax.f32 %v2018_v12, %v427_v4  ;;  %v449_v12 = vmax.f32 %v2027_v27, %v429_v15 }
 0x235   :  { %v470_v25 = vmax.f32 %v462_v21, 0.0 }
 0x236   :  { %829 = vrot.lane.b32.xlu1 %v750_v16, %s1568_s5  ;;  %v463_v9 = vadd.f32 %v1329_v1, %v448_v28  ;;  %v464_v20 = vadd.f32 %v1329_v1, %v449_v12 }
 0x237   :  { %v431_v56 = vpop.permute.xlu0 %430  ;;  %v433_v37 = vpop.permute.xlu1 %432 }
 0x238   :  { %v451_v52 = vmax.f32 %v2054_v23, %v433_v37  ;;  %v471_v33 = vmax.f32 %v463_v9, 0.0  ;;  %v472_v57 = vmax.f32 %v464_v20, 0.0  ;;  %v450_v29 = vmax.f32 %v2042_v19, %v431_v56 }
 0x23a   :  { %v2086_v63 = vadd.f32 %v1329_v1, %v451_v52  ;;  %v465_v61 = vadd.f32 %v1329_v1, %v450_v29 }
 0x23b   :  { %v435_v40 = vpop.permute.xlu0 %434  ;;  %v437_v43 = vpop.permute.xlu1 %436 }
 0x23c   :  { %v452_v44 = vmax.f32 %v420_v39, %v435_v40  ;;  %v453_v41 = vmax.f32 %v421_v46, %v437_v43  ;;  %v473_v22 = vmax.f32 %v465_v61, 0.0  ;;  %v474_v54 = vmax.f32 %v2086_v63, 0.0 }
 0x23e   :  { %v2089_v18 = vadd.f32 %v1329_v1, %v452_v44  ;;  %v2091_v47 = vadd.f32 %v1329_v1, %v453_v41 }
 0x23f   :  { %v802_v23 = vpop.permute.xlu0 %801  ;;  %v800_v48 = vpop.permute.xlu1 %799 }
 0x240   :  { %v832_v39 = vsel %vm831_vm1, %v800_v48, %v802_v23  ;;  %v475_v37 = vmax.f32 %v2089_v18, 0.0  ;;  %v476_v43 = vmax.f32 %v2091_v47, 0.0  ;;  %v1332_v23 = vld [vmem:[%s2235_s6] ss:$0 sm:$0xff] }
 0x243   :  { %v760_v7 = vpop.permute.xlu0 %759  ;;  %v806_v14 = vpop.permute.xlu1 %805 }
 0x244   :  { %v849_v24 = vsel %vm848_vm2, %v469_v8, %v760_v7 }
 0x245   :  { %v858_v11 = vsel %vm857_vm3, %v849_v24, %v832_v39 }
 0x246   :  { %1063 = vrot.lane.b32.xlu0 %v858_v11, %s1569_s2  ;;  %1390 = vmatprep.mubr.msk.f32.mxu1 %vm877_vm4, %v858_v11 }
 0x247   :  { %v804_v26 = vpop.permute.xlu0 %803  ;;  %v762_v30 = vpop.permute.xlu1 %761 }
 0x248   :  { %v833_v58 = vsel %vm831_vm1, %v804_v26, %v806_v14  ;;  %v850_v31 = vsel %vm848_vm2, %v470_v25, %v762_v30 }
 0x249   :  { %v859_v3 = vsel %vm857_vm3, %v850_v31, %v833_v58 }
 0x24a   :  { %1065 = vrot.lane.b32.xlu0 %v859_v3, %s1569_s2  ;;  %1391 = vmatmul.mubr.msk.f32.vlgmr.msra.gmra.mrb[0].mxu1 %vm877_vm4, %v859_v3 }
 0x24b   :  { %v810_v32 = vpop.permute.xlu0 %809  ;;  %v808_v10 = vpop.permute.xlu1 %807 }
 0x24c   :  { %v834_v17 = vsel %vm831_vm1, %v808_v10, %v810_v32 }
 0x24f   :  { %v764_v34 = vpop.permute.xlu0 %763 }
 0x250   :  { %v851_v36 = vsel %vm848_vm2, %v471_v33, %v764_v34  ;;  %v814_v53 = vpop.permute.xlu1 %813 }
 0x251   :  { %v860_v59 = vsel %vm857_vm3, %v851_v36, %v834_v17  ;;  %v1151_v36 = vld [vmem:[%s2236_s7] sm:$0xff] }
 0x252   :  { %1067 = vrot.lane.b32.xlu0 %v860_v59, %s1569_s2  ;;  %1393 = vmatprep.mubr.msk.f32.mxu1 %vm877_vm4, %v860_v59 }
 0x253   :  { %v812_v38 = vpop.permute.xlu0 %811 }
 0x254   :  { %v835_v27 = vsel %vm831_vm1, %v812_v38, %v814_v53  ;;  %v766_v5 = vpop.permute.xlu1 %765  ;;  %v1152_v53 = vld [vmem:[%s2236_s7 + $0x8] sm:$0xff] }
 0x255   :  { %v852_v13 = vsel %vm848_vm2, %v472_v57, %v766_v5  ;;  %v1446_v57 = vpack.c.bf16 %v1152_v53, %v1151_v36 }
 0x256   :  { %v861_v35 = vsel %vm857_vm3, %v852_v13, %v835_v27 }
 0x257   :  { %1069 = vrot.lane.b32.xlu0 %v861_v35, %s1569_s2  ;;  %1394 = vmatmul.mubr.msk.f32.gmra.mrb[2].mxu1 %vm877_vm4, %v861_v35 }
 0x258   :  { %1447 = vmatprep.subr.bf16.mxu1 %v1446_v57 }
 0x259   :  { %1449 = vmatpush3.bf16.msra.mxu1 %v1446_v57 }
 0x26c   :  { %v818_v45 = vpop.permute.xlu0 %817  ;;  %v816_v46 = vpop.permute.xlu1 %815 }
 0x26d   :  { %v836_v49 = vsel %vm831_vm1, %v816_v46, %v818_v45  ;;  %v1153_v45 = vld [vmem:[%s2236_s7 + $0x10] sm:$0xff]  ;;  %v1154_v46 = vld [vmem:[%s2236_s7 + $0x18] sm:$0xff] }
 0x270   :  { %v768_v60 = vpop.permute.xlu0 %767 }
 0x271   :  { %v853_v50 = vsel %vm848_vm2, %v473_v22, %v768_v60  ;;  %v1450_v60 = vpack.c.bf16 %v1154_v46, %v1153_v45 }
 0x272   :  { %v862_v62 = vsel %vm857_vm3, %v853_v50, %v836_v49 }
 0x273   :  { %1071 = vrot.lane.b32.xlu0 %v862_v62, %s1569_s2  ;;  %1396 = vmatprep.mubr.msk.f32.mxu1 %vm877_vm4, %v862_v62 }
 0x274   :  { %1451 = vmatprep.subr.bf16.mxu1 %v1450_v60 }
 0x275   :  { %1453 = vmatpush3.bf16.msra.mxu1 %v1450_v60 }
 0x288   :  { %v822_v55 = vpop.permute.xlu1 %821  ;;  %v820_v0 = vpop.permute.xlu0 %819 }
 0x289   :  { %v837_v2 = vsel %vm831_vm1, %v820_v0, %v822_v55 }
 0x28c   :  { %v770_v19 = vpop.permute.xlu1 %769 }
 0x28d   :  { %v854_v4 = vsel %vm848_vm2, %v474_v54, %v770_v19 }
 0x28e   :  { %v863_v15 = vsel %vm857_vm3, %v854_v4, %v837_v2 }
 0x28f   :  { %1073 = vrot.lane.b32.xlu0 %v863_v15, %s1569_s2  ;;  %1397 = vmatmul.mubr.msk.f32.gmra.mrb[4].mxu1 %vm877_vm4, %v863_v15 }
 0x294   :  { %v826_v16 = vpop.permute.xlu0 %825  ;;  %v824_v56 = vpop.permute.xlu1 %823 }
 0x295   :  { %v838_v1 = vsel %vm831_vm1, %v824_v56, %v826_v16 }
 0x298   :  { %v772_v52 = vpop.permute.xlu0 %771 }
 0x299   :  { %v855_v51 = vsel %vm848_vm2, %v475_v37, %v772_v52 }
 0x29a   :  { %v864_v63 = vsel %vm857_vm3, %v855_v51, %v838_v1 }
 0x29b   :  { %1075 = vrot.lane.b32.xlu0 %v864_v63, %s1569_s2  ;;  %1399 = vmatprep.mubr.msk.f32.mxu1 %vm877_vm4, %v864_v63 }
 0x2a4   :  { %v774_v40 = vpop.permute.xlu1 %773  ;;  %v828_v44 = vpop.permute.xlu0 %827 }
 0x2a5   :  { %v856_v6 = vsel %vm848_vm2, %v476_v43, %v774_v40 }
 0x2a8   :  { %v830_v41 = vpop.permute.xlu1 %829 }
 0x2a9   :  { %v839_v42 = vsel %vm831_vm1, %v828_v44, %v830_v41 }
 0x2aa   :  { %v865_v18 = vsel %vm857_vm3, %v856_v6, %v839_v42 }
 0x2ab   :  { %1077 = vrot.lane.b32.xlu0 %v865_v18, %s1569_s2  ;;  %1400 = vmatmul.mubr.msk.f32.gmra.mrb[6].mxu1 %vm877_vm4, %v865_v18 }
 0x2b8   :  { %v1064_v49 = vpop.permute.xlu0 %1063 }
 0x2bc   :  { %v1066_v2 = vpop.permute.xlu0 %1065 }
 0x2c4   :  { %v1068_v63 = vpop.permute.xlu0 %1067 }
 0x2c9   :  { %v1070_v6 = vpop.permute.xlu0 %1069 }
 0x31d   :  { %v1392_v48 = vpop.f32.mrb[0].mxu1 }
 0x31e   :  { %v974_v8 = vadd.f32 %v1392_v48, %v1332_v23  ;;  %v968_v21 = vpop.f32.mrb[1].mxu1 }
 0x31f   :  { %v969_v7 = vadd.f32 %v1332_v23, %v968_v21 }
 0x320   :  { %v1008_v47 = vmax.f32 %v974_v8, 0.0  ;;  %v1342_v32 = vmul.f32 -1.442695, %v974_v8 }
 0x321   :  { %v1007_v14 = vmax.f32 %v969_v7, 0.0  ;;  %v1341_v10 = vmul.f32 -1.442695, %v969_v7 }
 0x322   :  { %1113 = vrot.lane.b32.xlu1 %v1008_v47, %s1569_s2  ;;  %1472 = vpow2.f32 %v1342_v32 }
 0x323   :  { %1474 = vpow2.f32 %v1341_v10 }
 0x326   :  { %1111 = vrot.lane.b32.xlu1 %v1007_v14, %s1569_s2 }
 0x32a   :  { %v1395_v39 = vpop.f32.mrb[2].mxu1 }
 0x32b   :  { %v984_v24 = vadd.f32 %v1395_v39, %v1332_v23  ;;  %v978_v11 = vpop.f32.mrb[3].mxu1 }
 0x32c   :  { %v979_v28 = vadd.f32 %v1332_v23, %v978_v11  ;;  %v1473_v33 = vpop.eup %1472 }
 0x32d   :  { %v1010_v25 = vmax.f32 %v984_v24, 0.0  ;;  %v1344_v20 = vmul.f32 -1.442695, %v984_v24  ;;  %v1040_v38 = vadd.f32 1.0, %v1473_v33  ;;  %v1475_v35 = vpop.eup %1474 }
 0x32e   :  { %v1009_v26 = vmax.f32 %v979_v28, 0.0  ;;  %v1343_v27 = vmul.f32 -1.442695, %v979_v28  ;;  %v1039_v29 = vadd.f32 1.0, %v1475_v35 }
 0x32f   :  { %1117 = vrot.lane.b32.xlu1 %v1010_v25, %s1569_s2  ;;  %1476 = vpow2.f32 %v1344_v20 }
 0x330   :  { %1478 = vrcp.f32 %v1040_v38 }
 0x331   :  { %1480 = vpow2.f32 %v1343_v27 }
 0x332   :  { %1482 = vrcp.f32 %v1039_v29 }
 0x333   :  { %1115 = vrot.lane.b32.xlu1 %v1009_v26, %s1569_s2 }
 0x339   :  { %v1477_v22 = vpop.eup %1476 }
 0x33a   :  { %v1479_v50 = vpop.eup %1478  ;;  %v1042_v62 = vadd.f32 1.0, %v1477_v22 }
 0x33b   :  { %v1481_v55 = vpop.eup %1480  ;;  %v1096_v54 = vsub.f32 1.0, %v1479_v50  ;;  %v1088_v15 = vmul.f32 %v1479_v50, %v1066_v2 }
 0x33c   :  { %1484 = vrcp.f32 %v1042_v62  ;;  %v1041_v0 = vadd.f32 1.0, %v1481_v55  ;;  %v1483_v19 = vpop.eup %1482 }
 0x33d   :  { %v1095_v37 = vsub.f32 1.0, %v1483_v19  ;;  %v1087_v1 = vmul.f32 %v1483_v19, %v1064_v49 }
 0x33e   :  { %1486 = vrcp.f32 %v1041_v0 }
 0x346   :  { %v1485_v43 = vpop.eup %1484 }
 0x347   :  { %v1098_v44 = vsub.f32 1.0, %v1485_v43  ;;  %v1090_v18 = vmul.f32 %v1485_v43, %v1070_v6 }
 0x348   :  { %v1487_v41 = vpop.eup %1486 }
 0x349   :  { %v1097_v8 = vsub.f32 1.0, %v1487_v41  ;;  %v1089_v47 = vmul.f32 %v1487_v41, %v1068_v63 }
 0x362   :  { %v1398_v30 = vpop.f32.mrb[4].mxu1 }
 0x363   :  { %v2146_v58 = vadd.f32 %v1398_v30, %v1332_v23  ;;  %v988_v31 = vpop.f32.mrb[5].mxu1 }
 0x364   :  { %v2149_v9 = vadd.f32 %v1332_v23, %v988_v31 }
 0x365   :  { %v1012_v3 = vmax.f32 %v2146_v58, 0.0  ;;  %v1346_v39 = vmul.f32 -1.442695, %v2146_v58 }
 0x366   :  { %v1011_v12 = vmax.f32 %v2149_v9, 0.0  ;;  %v1345_v24 = vmul.f32 -1.442695, %v2149_v9 }
 0x367   :  { %1121 = vrot.lane.b32.xlu1 %v1012_v3, %s1569_s2  ;;  %1488 = vpow2.f32 %v1346_v39  ;;  %v1072_v3 = vpop.permute.xlu0 %1071 }
 0x368   :  { %1490 = vpow2.f32 %v1345_v24 }
 0x36b   :  { %1119 = vrot.lane.b32.xlu1 %v1011_v12, %s1569_s2  ;;  %v1074_v58 = vpop.permute.xlu0 %1073 }
 0x36f   :  { %v1076_v45 = vpop.permute.xlu0 %1075 }
 0x371   :  { %v1489_v11 = vpop.eup %1488 }
 0x372   :  { %v1044_v25 = vadd.f32 1.0, %v1489_v11  ;;  %v1491_v28 = vpop.eup %1490 }
 0x373   :  { %v1043_v26 = vadd.f32 1.0, %v1491_v28  ;;  %v1078_v62 = vpop.permute.xlu0 %1077 }
 0x374   :  { %1492 = vrcp.f32 %v1044_v25 }
 0x375   :  { %1494 = vrcp.f32 %v1043_v26 }
 0x37e   :  { %v1401_v34 = vpop.f32.mrb[6].mxu1  ;;  %v1493_v31 = vpop.eup %1492 }
 0x37f   :  { %v998_v17 = vpop.f32.mrb[7].mxu1  ;;  %v2162_v5 = vadd.f32 %v1401_v34, %v1332_v23  ;;  %v1100_v32 = vsub.f32 1.0, %v1493_v31  ;;  %v1495_v10 = vpop.eup %1494  ;;  %v1092_v20 = vmul.f32 %v1493_v31, %v1074_v58 }
 0x380   :  { %v2160_v59 = vadd.f32 %v1332_v23, %v998_v17  ;;  %v1099_v17 = vsub.f32 1.0, %v1495_v10  ;;  %v1091_v53 = vmul.f32 %v1495_v10, %v1072_v3 }
 0x381   :  { %v1014_v61 = vmax.f32 %v2162_v5, 0.0  ;;  %v1348_v12 = vmul.f32 -1.442695, %v2162_v5 }
 0x382   :  { %v1013_v13 = vmax.f32 %v2160_v59, 0.0  ;;  %v1347_v30 = vmul.f32 -1.442695, %v2160_v59 }
 0x384   :  { %1123 = vrot.lane.b32.xlu1 %v1013_v13, %s1569_s2  ;;  %1496 = vpow2.f32 %v1347_v30 }
 0x385   :  { %1498 = vpow2.f32 %v1348_v12 }
 0x388   :  { %1125 = vrot.lane.b32.xlu1 %v1014_v61, %s1569_s2 }
 0x38e   :  { %v1497_v38 = vpop.eup %1496 }
 0x38f   :  { %v1045_v27 = vadd.f32 1.0, %v1497_v38  ;;  %v1499_v5 = vpop.eup %1498 }
 0x390   :  { %v1046_v13 = vadd.f32 1.0, %v1499_v5 }
 0x391   :  { %1500 = vrcp.f32 %v1045_v27 }
 0x392   :  { %1502 = vrcp.f32 %v1046_v13 }
 0x394   :  { %v1114_v4 = vpop.permute.xlu1 %1113 }
 0x395   :  { %v1136_v16 = vmul.f32 %v1114_v4, %v1096_v54 }
 0x397   :  { %v1144_v56 = vadd.f32 %v1136_v16, %v1088_v15 }
 0x398   :  { %v1112_v52 = vpop.permute.xlu1 %1111 }
 0x399   :  { %v1135_v51 = vmul.f32 %v1112_v52, %v1095_v37  ;;  %1172 = vrot.lane.b32.xlu1 %v1144_v56, %s1564_s21 }
 0x39b   :  { %v1143_v40 = vadd.f32 %v1135_v51, %v1087_v1  ;;  %v1501_v35 = vpop.eup %1500  ;;  %v1349_v51 = vld [vmem:[%s2237_s8] ss:$0 sm:$0xff] }
 0x39c   :  { %v1101_v29 = vsub.f32 1.0, %v1501_v35  ;;  %v1503_v61 = vpop.eup %1502  ;;  %v1093_v22 = vmul.f32 %v1501_v35, %v1076_v45 }
 0x39d   :  { %1170 = vrot.lane.b32.xlu0 %v1143_v40, %s1564_s21  ;;  %v1102_v50 = vsub.f32 1.0, %v1503_v61  ;;  %v1094_v0 = vmul.f32 %v1503_v61, %v1078_v62 }
 0x3a1   :  { %v1118_v42 = vpop.permute.xlu1 %1117 }
 0x3a2   :  { %v1138_v23 = vmul.f32 %v1118_v42, %v1098_v44 }
 0x3a4   :  { %v1146_v48 = vadd.f32 %v1138_v23, %v1090_v18 }
 0x3a5   :  { %v1116_v21 = vpop.permute.xlu1 %1115 }
 0x3a6   :  { %v1137_v7 = vmul.f32 %v1116_v21, %v1097_v8  ;;  %1176 = vrot.lane.b32.xlu1 %v1146_v48, %s1564_s21 }
 0x3a8   :  { %v1145_v14 = vadd.f32 %v1137_v7, %v1089_v47 }
 0x3aa   :  { %1174 = vrot.lane.b32.xlu0 %v1145_v14, %s1564_s21 }
 0x3d9   :  { %v1122_v33 = vpop.permute.xlu1 %1121 }
 0x3da   :  { %v1140_v9 = vmul.f32 %v1122_v33, %v1100_v32 }
 0x3dc   :  { %v1148_v34 = vadd.f32 %v1140_v9, %v1092_v20 }
 0x3dd   :  { %v1120_v36 = vpop.permute.xlu1 %1119 }
 0x3de   :  { %v1139_v57 = vmul.f32 %v1120_v36, %v1099_v17  ;;  %1180 = vrot.lane.b32.xlu1 %v1148_v34, %s1564_s21 }
 0x3e0   :  { %v1147_v59 = vadd.f32 %v1139_v57, %v1091_v53 }
 0x3e2   :  { %1178 = vrot.lane.b32.xlu0 %v1147_v59, %s1564_s21 }
 0x3f6   :  { %v1124_v46 = vpop.permute.xlu1 %1123 }
 0x3f7   :  { %v1141_v60 = vmul.f32 %v1124_v46, %v1101_v29 }
 0x3f9   :  { %v1149_v49 = vadd.f32 %v1141_v60, %v1093_v22 }
 0x3fa   :  { %v1126_v55 = vpop.permute.xlu1 %1125 }
 0x3fb   :  { %v1142_v54 = vmul.f32 %v1126_v55, %v1102_v50  ;;  %1182 = vrot.lane.b32.xlu0 %v1149_v49, %s1564_s21 }
 0x3fd   :  { %v1150_v19 = vadd.f32 %v1142_v54, %v1094_v0 }
 0x3ff   :  { %1184 = vrot.lane.b32.xlu1 %v1150_v19, %s1564_s21 }
 0x40b   :  { %v1173_v4 = vpop.permute.xlu1 %1172 }
 0x40f   :  { %v1171_v2 = vpop.permute.xlu0 %1170 }
 0x410   :  { %1410 = vmatprep.mubr.msk.f32.mxu1 %vm877_vm4, %v1171_v2 }
 0x411   :  { %1411 = vmatmul.mubr.msk.f32.vlgmr.msra.gmra.mrb[8].mxu1 %vm877_vm4, %v1173_v4 }
 0x418   :  { %v1177_v16 = vpop.permute.xlu1 %1176 }
 0x41c   :  { %v1175_v15 = vpop.permute.xlu0 %1174 }
 0x41d   :  { %1413 = vmatprep.mubr.msk.f32.mxu1 %vm877_vm4, %v1175_v15 }
 0x41e   :  { %1414 = vmatmul.mubr.msk.f32.gmra.mrb[10].mxu1 %vm877_vm4, %v1177_v16 }
 0x450   :  { %v1181_v37 = vpop.permute.xlu1 %1180 }
 0x454   :  { %v1179_v56 = vpop.permute.xlu0 %1178 }
 0x455   :  { %1416 = vmatprep.mubr.msk.f32.mxu1 %vm877_vm4, %v1179_v56 }
 0x456   :  { %1417 = vmatmul.mubr.msk.f32.gmra.mrb[12].mxu1 %vm877_vm4, %v1181_v37 }
 0x46d   :  { %v1183_v52 = vpop.permute.xlu0 %1182 }
 0x46e   :  { %1419 = vmatprep.mubr.msk.f32.mxu1 %vm877_vm4, %v1183_v52 }
 0x471   :  { %v1185_v1 = vpop.permute.xlu1 %1184 }
 0x472   :  { %1420 = vmatmul.mubr.msk.f32.gmra.mrb[14].mxu1 %vm877_vm4, %v1185_v1 }
 0x4e4   :  { %v1412_v63 = vpop.f32.mrb[8].mxu1 }
 0x4e5   :  { %v1274_v40 = vadd.f32 %v1412_v63, %v1349_v51  ;;  %v1268_v43 = vpop.f32.mrb[9].mxu1 }
 0x4e6   :  { %v1269_v44 = vadd.f32 %v1349_v51, %v1268_v43 }
 0x4e7   :  { %1308 = vst.msk [vmem:[%s2238_s9 + $0x8] sm:$0xff] %vm857_vm3, %v1274_v40 }
 0x4e8   :  { %1307 = vst.msk [vmem:[%s2238_s9] sm:$0xff] %vm857_vm3, %v1269_v44 }
 0x4f1   :  { %v1415_v41 = vpop.f32.mrb[10].mxu1 }
 0x4f2   :  { %v1284_v6 = vadd.f32 %v1415_v41, %v1349_v51  ;;  %v1278_v42 = vpop.f32.mrb[11].mxu1 }
 0x4f3   :  { %v1279_v18 = vadd.f32 %v1349_v51, %v1278_v42 }
 0x4f4   :  { %1310 = vst.msk [vmem:[%s2238_s9 + $0x18] sm:$0xff] %vm857_vm3, %v1284_v6 }
 0x4f5   :  { %1309 = vst.msk [vmem:[%s2238_s9 + $0x10] sm:$0xff] %vm857_vm3, %v1279_v18 }
 0x529   :  { %v1418_v23 = vpop.f32.mrb[12].mxu1 }
 0x52a   :  { %v1294_v48 = vadd.f32 %v1418_v23, %v1349_v51  ;;  %v1288_v8 = vpop.f32.mrb[13].mxu1 }
 0x52b   :  { %v1289_v21 = vadd.f32 %v1349_v51, %v1288_v8 }
 0x52c   :  { %1312 = vst.msk [vmem:[%s2238_s9 + $0x28] sm:$0xff] %vm857_vm3, %v1294_v48 }
 0x52d   :  { %1311 = vst.msk [vmem:[%s2238_s9 + $0x20] sm:$0xff] %vm857_vm3, %v1289_v21 }
 0x545   :  { %v1421_v47 = vpop.f32.mrb[14].mxu1 }
 0x546   :  { %v1304_v7 = vadd.f32 %v1421_v47, %v1349_v51  ;;  %v1298_v14 = vpop.f32.mrb[15].mxu1 }
 0x547   :  { %v1299_v39 = vadd.f32 %v1349_v51, %v1298_v14 }
 0x548   :  { %1314 = vst.msk [vmem:[%s2238_s9 + $0x38] sm:$0xff] %vm857_vm3, %v1304_v7 }
 0x549   :  { %1313 = vst.msk [vmem:[%s2238_s9 + $0x30] sm:$0xff] %vm857_vm3, %v1299_v39 }
 0x54a   :  { %1319 = vsyncpa [#allocation3], 1 }
 0x54b   :  { %1320 = vsyncpa [#allocation5], 1 }

</bundles_post_ra>
